<compile_context>
chip_gen: v6e
topology: v6e:2x2x1
jax: 0.10.0
libtpu: 0.0.40
codegen_flags: <defaults>
</compile_context>

<pallas_src>
import functools

import jax
import jax.numpy as jnp
import numpy as np
from jax import lax
from jax.experimental import pallas as pl


# ---------------------------------------------------------------------------
# The single fused Pallas kernel
# ---------------------------------------------------------------------------
def _fused_encoder_kernel(p1_ref, m1_ref, hm_ref, prior_ref,
                          w1_ref, b1_ref, w2_ref, b2_ref, w3_ref, b3_ref,
                          wp_ref, bp_ref, w1p_ref, w1x_ref, bl1_ref,
                          w2t_ref, bl2_ref, o_ref, *, n_batch):
    f32, bf16 = jnp.float32, jnp.bfloat16

    # conv1 (+bias, ReLU): ONE matmul against an 81-block block-diagonal weight.
    # Rows are (q3, n); lanes are (t3, t2, c1).  The m1 multiply zeroes lanes
    # that correspond to conv2's spatial zero-padding (conv2's input is 0 there).
    a1 = jnp.dot(p1_ref[...], w1_ref[...], preferred_element_type=f32)      # (9n, 648)
    a1 = jnp.maximum(a1 + b1_ref[...], 0.0) * m1_ref[...]

    # conv2 (+folded BN, ReLU): ONE matmul, 9-block block-diagonal weight.
    a2 = jnp.dot(a1.astype(bf16), w2_ref[...], preferred_element_type=f32)  # (9n, 144)
    a2 = jnp.maximum(a2 + b2_ref[...], 0.0)

    # conv3 (+bias, ReLU): ONE matmul whose weight is lane-tiled over the 9
    # output positions, so every row's 288 lanes hold (q3', c3) replicas of
    # that row's conv3 output.
    a3 = jnp.dot(a2.astype(bf16), w3_ref[...], preferred_element_type=f32)  # (9n, 288)
    a3 = jnp.maximum(a3 + b3_ref[...], 0.0)

    # Keep only each row's own q3 lane-group, then fold the 9 row blocks into
    # the per-sample flattened conv feature vector (lane order = q3*32 + c3).
    a3 = a3 * hm_ref[...]
    xfeat = a3[0:n_batch, :]
    for q3 in range(1, 9):
        xfeat = xfeat + a3[q3 * n_batch:(q3 + 1) * n_batch, :]              # (n, 288)

    # head: prior_fc -> (split) Linear(296,32) + ReLU -> Linear(32, esd).
    p = jnp.dot(prior_ref[...], wp_ref[...], preferred_element_type=f32) + bp_ref[...]
    h = jnp.dot(p.astype(bf16), w1p_ref[...], preferred_element_type=f32)
    h = h + jnp.dot(xfeat.astype(bf16), w1x_ref[...], preferred_element_type=f32)
    h = jnp.maximum(h + bl1_ref[...], 0.0)
    o_ref[...] = jnp.dot(h.astype(bf16), w2t_ref[...],
                         preferred_element_type=f32) + bl2_ref[...]


def _full_spec(shape):
    # Gridless call: block == full array, nullary index map.
    return pl.BlockSpec(shape, lambda: (0,) * len(shape))


def fused_encoder_pallas(p1, m1, hm, prior, prep):
    n = prior.shape[0]
    esd = prep['w2t'].shape[1]
    args = (p1, m1, hm, prior,
            prep['w1bd'], prep['b1t'], prep['w2bd'], prep['b2t'],
            prep['w3s'], prep['b3t'], prep['wpt'], prep['bp'],
            prep['w1p'], prep['w1x'], prep['bl1'], prep['w2t'], prep['bl2'])

    r = 9 * n
    flops = 2 * (r * 729 * 648          # conv1 (block-diag, incl. structural zeros)
                 + r * 648 * 144        # conv2 (block-diag)
                 + r * 144 * 288        # conv3 (lane-tiled over q3)
                 + n * 3 * 8            # prior_fc
                 + n * 8 * 32           # head, prior part of W1
                 + n * 288 * 32         # head, conv-feature part of W1
                 + n * 32 * esd)        # final Linear
    bytes_accessed = (sum(int(np.prod(a.shape)) * a.dtype.itemsize for a in args)
                      + n * esd * 4)

    return pl.pallas_call(
        functools.partial(_fused_encoder_kernel, n_batch=n),
        out_shape=jax.ShapeDtypeStruct((n, esd), jnp.float32),
        in_specs=[_full_spec(a.shape) for a in args],
        out_specs=_full_spec((n, esd)),
        cost_estimate=pl.CostEstimate(flops=flops, transcendentals=0,
                                      bytes_accessed=bytes_accessed),
    )(*args)


# ---------------------------------------------------------------------------
# One-time prep: BN folding, block-diagonal / lane-tiled weight construction,
# flatten folded into a row-permuted W1.  All hoisted out of the forward.
# ---------------------------------------------------------------------------
def prepare_params(params, eps=1e-5):
    f32, bf16 = jnp.float32, jnp.bfloat16
    s = params['bn_gamma'] / jnp.sqrt(params['bn_var'] + eps)
    w2f = params['w2'] * s[:, None, None, None]
    b2f = (params['b2'] - params['bn_mean']) * s + params['bn_beta']

    w1m = jnp.transpose(params['w1'], (2, 3, 1, 0)).reshape(9, 8)      # (t1, c1)
    w2m = jnp.transpose(w2f, (2, 3, 1, 0)).reshape(72, 16)             # (t2*8+c1, c2)
    w3m = jnp.transpose(params['w3'], (2, 3, 1, 0)).reshape(144, 32)   # (t3*16+c2, c3)

    wl1_t = params['wl1'].T                                            # (296, 32)
    # x-part of W1 with rows re-ordered to (q3, c3) = q3*32 + c3, matching the
    # in-kernel flattened feature lane order (NCHW flatten index = c3*9 + q3).
    w1x = wl1_t[8:, :].reshape(32, 9, 32).transpose(1, 0, 2).reshape(288, 32)

    return dict(
        w1bd=jnp.kron(jnp.eye(81, dtype=f32), w1m).astype(bf16),       # (729, 648)
        b1t=jnp.tile(params['b1'], 81).reshape(1, 648).astype(f32),
        w2bd=jnp.kron(jnp.eye(9, dtype=f32), w2m).astype(bf16),        # (648, 144)
        b2t=jnp.tile(b2f, 9).reshape(1, 144).astype(f32),
        w3s=jnp.tile(w3m, (1, 9)).astype(bf16),                        # (144, 288)
        b3t=jnp.tile(params['b3'], 9).reshape(1, 288).astype(f32),
        wpt=params['wp'].T.astype(bf16),                               # (3, 8)
        bp=params['bp'].reshape(1, 8).astype(f32),
        w1p=wl1_t[:8, :].astype(bf16),                                 # (8, 32)
        w1x=w1x.astype(bf16),                                          # (288, 32)
        bl1=params['bl1'].reshape(1, 32).astype(f32),
        w2t=params['wl2'].T.astype(bf16),                              # (32, esd)
        bl2=params['bl2'].reshape(1, -1).astype(f32),
    )


def build_plan(n_batch):
    """Static gather indices / masks for the lane-packed fused layout.

    Row index = q3 * n_batch + n  (q3 = conv3 output position, n = sample).
    p1 lane index  = t3*81 + t2*9 + t1  (conv3 tap, conv2 tap, conv1 tap).
    mask lane idx  = t3*72 + t2*8 + c1  (1.0 unless conv2 zero-padding).
    headm lane idx = q3'*32 + c3        (1.0 iff q3' == row's q3).
    """
    H0 = W0 = 28
    rows = 9 * n_batch
    zero_idx = n_batch * H0 * W0                 # points at the appended 0.0
    idx = np.full((rows, 729), zero_idx, dtype=np.int32)
    mask = np.zeros((rows, 648), dtype=np.float32)
    headm = np.zeros((rows, 288), dtype=np.float32)
    for q3 in range(9):
        h3, w3 = divmod(q3, 3)
        headm[q3 * n_batch:(q3 + 1) * n_batch, q3 * 32:(q3 + 1) * 32] = 1.0
        for t3 in range(9):
            i3, j3 = divmod(t3, 3)
            h2, w2 = 2 * h3 + i3, 2 * w3 + j3            # conv3: stride 2, pad 0
            for t2 in range(9):
                i2, j2 = divmod(t2, 3)
                h1, w1 = 2 * h2 + i2 - 1, 2 * w2 + j2 - 1  # conv2: stride 2, pad 1
                if not (0 <= h1 < 14 and 0 <= w1 < 14):
                    continue                               # conv2 zero-padding lane
                k = t3 * 9 + t2
                for n in range(n_batch):
                    r = q3 * n_batch + n
                    mask[r, k * 8:(k + 1) * 8] = 1.0
                    for t1 in range(9):
                        i1, j1 = divmod(t1, 3)
                        h0, w0 = 2 * h1 + i1 - 1, 2 * w1 + j1 - 1   # conv1: stride 2, pad 1
                        if 0 <= h0 < H0 and 0 <= w0 < W0:
                            idx[r, k * 9 + t1] = n * H0 * W0 + h0 * W0 + w0
    return jnp.asarray(idx), jnp.asarray(mask), jnp.asarray(headm)


def encoder_forward(prep, plan, x_nchw, prior):
    idx, mask, headm = plan
    n = x_nchw.shape[0]
    # Only pre-kernel glue: one constant-index gather of the raw pixels into
    # the lane-packed conv1 tap columns (Cin=1, so NCHW flatten == raster order).
    xz = jnp.concatenate([x_nchw.reshape(n * 28 * 28).astype(jnp.float32),
                          jnp.zeros((1,), jnp.float32)])
    p1 = jnp.take(xz, idx).astype(jnp.bfloat16)            # (9n, 729) bf16
    return fused_encoder_pallas(p1, mask, headm, prior.astype(jnp.bfloat16), prep)


# ---------------------------------------------------------------------------
# Parameters & pure-JAX reference (for correctness checking)
# ---------------------------------------------------------------------------
def init_params(key, encoded_space_dim):
    ks = jax.random.split(key, 20)

    def rnd(k, shape, scale=0.1):
        return (scale * jax.random.normal(k, shape)).astype(jnp.float32)

    return dict(
        w1=rnd(ks[0], (8, 1, 3, 3)), b1=rnd(ks[1], (8,)),
        w2=rnd(ks[2], (16, 8, 3, 3)), b2=rnd(ks[3], (16,)),
        bn_gamma=(1.0 + rnd(ks[4], (16,))), bn_beta=rnd(ks[5], (16,)),
        bn_mean=rnd(ks[6], (16,)),
        bn_var=(1.0 + 0.1 * jax.random.uniform(ks[7], (16,), dtype=jnp.float32)),
        w3=rnd(ks[8], (32, 16, 3, 3)), b3=rnd(ks[9], (32,)),
        wp=rnd(ks[10], (8, 3)), bp=rnd(ks[11], (8,)),
        wl1=rnd(ks[12], (32, 296)), bl1=rnd(ks[13], (32,)),
        wl2=rnd(ks[14], (encoded_space_dim, 32)), bl2=rnd(ks[15], (encoded_space_dim,)),
    )


def reference_forward(params, x_nchw, prior):
    eps = 1e-5

    def conv_relu(x, w, b, stride, pad):
        y = lax.conv_general_dilated(
            x, w, (stride, stride), [(pad, pad), (pad, pad)],
            dimension_numbers=('NCHW', 'OIHW', 'NCHW'))
        return jax.nn.relu(y + b[None, :, None, None])

    x = conv_relu(x_nchw, params['w1'], params['b1'], 2, 1)
    scale = params['bn_gamma'] / jnp.sqrt(params['bn_var'] + eps)
    w2f = params['w2'] * scale[:, None, None, None]
    b2f = (params['b2'] - params['bn_mean']) * scale + params['bn_beta']
    x = conv_relu(x, w2f, b2f, 2, 1)
    x = conv_relu(x, params['w3'], params['b3'], 2, 0)
    xflat = x.reshape(x.shape[0], -1)
    p = prior @ params['wp'].T + params['bp']
    comb = jnp.concatenate([p, xflat], axis=1)
    h = jax.nn.relu(comb @ params['wl1'].T + params['bl1'])
    return h @ params['wl2'].T + params['bl2']


if __name__ == "__main__":
    key = jax.random.PRNGKey(0)
    kp, kx, kpr = jax.random.split(key, 3)

    encoded_space_dim = 16
    params = init_params(kp, encoded_space_dim)

    # Spatial size fixed at 28x28: Linear(296) implies a 32x3x3 conv output.
    x = jax.random.normal(kx, (2, 1, 28, 28), dtype=jnp.float32)
    prior = jax.random.normal(kpr, (2, 3), dtype=jnp.float32)

    prep = prepare_params(params)      # one-time weight prep (hoisted out of forward)
    plan = build_plan(x.shape[0])      # one-time static gather plan for this batch size

    fwd = jax.jit(lambda xx, pp: encoder_forward(prep, plan, xx, pp))
    out = jax.block_until_ready(fwd(x, prior))
    assert out.shape == (2, encoded_space_dim)

    ref = reference_forward(params, x, prior)
    # Tolerance sized for bf16 MXU operands (f32 accumulation / bias / ReLU).
    np.testing.assert_allclose(np.asarray(out), np.asarray(ref),
                               rtol=2e-2, atol=2e-2)
    print("KERNEL_OK")
</pallas_src>

<mosaic_0001>
module attributes {stable_mosaic.version = 11 : i64} {
  func.func @_fused_encoder_kernel(%arg0: memref<18x729xbf16, #tpu.memory_space<vmem>>, %arg1: memref<18x648xf32, #tpu.memory_space<vmem>>, %arg2: memref<18x288xf32, #tpu.memory_space<vmem>>, %arg3: memref<2x3xbf16, #tpu.memory_space<vmem>>, %arg4: memref<729x648xbf16, #tpu.memory_space<vmem>>, %arg5: memref<1x648xf32, #tpu.memory_space<vmem>>, %arg6: memref<648x144xbf16, #tpu.memory_space<vmem>>, %arg7: memref<1x144xf32, #tpu.memory_space<vmem>>, %arg8: memref<144x288xbf16, #tpu.memory_space<vmem>>, %arg9: memref<1x288xf32, #tpu.memory_space<vmem>>, %arg10: memref<3x8xbf16, #tpu.memory_space<vmem>>, %arg11: memref<1x8xf32, #tpu.memory_space<vmem>>, %arg12: memref<8x32xbf16, #tpu.memory_space<vmem>>, %arg13: memref<288x32xbf16, #tpu.memory_space<vmem>>, %arg14: memref<1x32xf32, #tpu.memory_space<vmem>>, %arg15: memref<32x16xbf16, #tpu.memory_space<vmem>>, %arg16: memref<1x16xf32, #tpu.memory_space<vmem>>, %arg17: memref<2x16xf32, #tpu.memory_space<vmem>>) attributes {dimension_semantics = [], scalar_prefetch = 0 : i64, scratch_operands = 0 : i64, tpu.core_type = #tpu.core_type<tc>} {
    %c0 = arith.constant 0 : index
    %c0_0 = arith.constant 0 : index
    %0 = vector.load %arg0[%c0, %c0_0] : memref<18x729xbf16, #tpu.memory_space<vmem>>, vector<18x729xbf16>
    %c0_1 = arith.constant 0 : index
    %c0_2 = arith.constant 0 : index
    %1 = vector.load %arg4[%c0_1, %c0_2] : memref<729x648xbf16, #tpu.memory_space<vmem>>, vector<729x648xbf16>
    %cst = arith.constant dense<0.000000e+00> : vector<18x648xf32>
    %2 = tpu.matmul %0, %1, %cst {dimension_numbers = #tpu.dot_dimension_numbers<[1], [0], [0], [1], [0, 0, 1, 1], [], []>} : vector<18x729xbf16>, vector<729x648xbf16>, vector<18x648xf32> -> vector<18x648xf32>
    %c0_3 = arith.constant 0 : index
    %c0_4 = arith.constant 0 : index
    %3 = vector.load %arg5[%c0_3, %c0_4] : memref<1x648xf32, #tpu.memory_space<vmem>>, vector<1x648xf32>
    %4 = vector.broadcast %3 : vector<1x648xf32> to vector<18x648xf32>
    %5 = arith.addf %2, %4 : vector<18x648xf32>
    %cst_5 = arith.constant 0.000000e+00 : f32
    %6 = vector.broadcast %cst_5 : f32 to vector<18x648xf32>
    %7 = arith.maximumf %5, %6 : vector<18x648xf32>
    %c0_6 = arith.constant 0 : index
    %c0_7 = arith.constant 0 : index
    %8 = vector.load %arg1[%c0_6, %c0_7] : memref<18x648xf32, #tpu.memory_space<vmem>>, vector<18x648xf32>
    %9 = arith.mulf %7, %8 : vector<18x648xf32>
    %10 = arith.truncf %9 : vector<18x648xf32> to vector<18x648xbf16>
    %c0_8 = arith.constant 0 : index
    %c0_9 = arith.constant 0 : index
    %11 = vector.load %arg6[%c0_8, %c0_9] : memref<648x144xbf16, #tpu.memory_space<vmem>>, vector<648x144xbf16>
    %cst_10 = arith.constant dense<0.000000e+00> : vector<18x144xf32>
    %12 = tpu.matmul %10, %11, %cst_10 {dimension_numbers = #tpu.dot_dimension_numbers<[1], [0], [0], [1], [0, 0, 1, 1], [], []>} : vector<18x648xbf16>, vector<648x144xbf16>, vector<18x144xf32> -> vector<18x144xf32>
    %c0_11 = arith.constant 0 : index
    %c0_12 = arith.constant 0 : index
    %13 = vector.load %arg7[%c0_11, %c0_12] : memref<1x144xf32, #tpu.memory_space<vmem>>, vector<1x144xf32>
    %14 = vector.broadcast %13 : vector<1x144xf32> to vector<18x144xf32>
    %15 = arith.addf %12, %14 : vector<18x144xf32>
    %cst_13 = arith.constant 0.000000e+00 : f32
    %16 = vector.broadcast %cst_13 : f32 to vector<18x144xf32>
    %17 = arith.maximumf %15, %16 : vector<18x144xf32>
    %18 = arith.truncf %17 : vector<18x144xf32> to vector<18x144xbf16>
    %c0_14 = arith.constant 0 : index
    %c0_15 = arith.constant 0 : index
    %19 = vector.load %arg8[%c0_14, %c0_15] : memref<144x288xbf16, #tpu.memory_space<vmem>>, vector<144x288xbf16>
    %cst_16 = arith.constant dense<0.000000e+00> : vector<18x288xf32>
    %20 = tpu.matmul %18, %19, %cst_16 {dimension_numbers = #tpu.dot_dimension_numbers<[1], [0], [0], [1], [0, 0, 1, 1], [], []>} : vector<18x144xbf16>, vector<144x288xbf16>, vector<18x288xf32> -> vector<18x288xf32>
    %c0_17 = arith.constant 0 : index
    %c0_18 = arith.constant 0 : index
    %21 = vector.load %arg9[%c0_17, %c0_18] : memref<1x288xf32, #tpu.memory_space<vmem>>, vector<1x288xf32>
    %22 = vector.broadcast %21 : vector<1x288xf32> to vector<18x288xf32>
    %23 = arith.addf %20, %22 : vector<18x288xf32>
    %cst_19 = arith.constant 0.000000e+00 : f32
    %24 = vector.broadcast %cst_19 : f32 to vector<18x288xf32>
    %25 = arith.maximumf %23, %24 : vector<18x288xf32>
    %c0_20 = arith.constant 0 : index
    %c0_21 = arith.constant 0 : index
    %26 = vector.load %arg2[%c0_20, %c0_21] : memref<18x288xf32, #tpu.memory_space<vmem>>, vector<18x288xf32>
    %27 = arith.mulf %25, %26 : vector<18x288xf32>
    %28 = vector.extract_strided_slice %27 {offsets = [0, 0], sizes = [2, 288], strides = [1, 1]} : vector<18x288xf32> to vector<2x288xf32>
    %29 = vector.extract_strided_slice %27 {offsets = [2, 0], sizes = [2, 288], strides = [1, 1]} : vector<18x288xf32> to vector<2x288xf32>
    %30 = arith.addf %28, %29 : vector<2x288xf32>
    %31 = vector.extract_strided_slice %27 {offsets = [4, 0], sizes = [2, 288], strides = [1, 1]} : vector<18x288xf32> to vector<2x288xf32>
    %32 = arith.addf %30, %31 : vector<2x288xf32>
    %33 = vector.extract_strided_slice %27 {offsets = [6, 0], sizes = [2, 288], strides = [1, 1]} : vector<18x288xf32> to vector<2x288xf32>
    %34 = arith.addf %32, %33 : vector<2x288xf32>
    %35 = vector.extract_strided_slice %27 {offsets = [8, 0], sizes = [2, 288], strides = [1, 1]} : vector<18x288xf32> to vector<2x288xf32>
    %36 = arith.addf %34, %35 : vector<2x288xf32>
    %37 = vector.extract_strided_slice %27 {offsets = [10, 0], sizes = [2, 288], strides = [1, 1]} : vector<18x288xf32> to vector<2x288xf32>
    %38 = arith.addf %36, %37 : vector<2x288xf32>
    %39 = vector.extract_strided_slice %27 {offsets = [12, 0], sizes = [2, 288], strides = [1, 1]} : vector<18x288xf32> to vector<2x288xf32>
    %40 = arith.addf %38, %39 : vector<2x288xf32>
    %41 = vector.extract_strided_slice %27 {offsets = [14, 0], sizes = [2, 288], strides = [1, 1]} : vector<18x288xf32> to vector<2x288xf32>
    %42 = arith.addf %40, %41 : vector<2x288xf32>
    %43 = vector.extract_strided_slice %27 {offsets = [16, 0], sizes = [2, 288], strides = [1, 1]} : vector<18x288xf32> to vector<2x288xf32>
    %44 = arith.addf %42, %43 : vector<2x288xf32>
    %c0_22 = arith.constant 0 : index
    %c0_23 = arith.constant 0 : index
    %45 = vector.load %arg3[%c0_22, %c0_23] : memref<2x3xbf16, #tpu.memory_space<vmem>>, vector<2x3xbf16>
    %c0_24 = arith.constant 0 : index
    %c0_25 = arith.constant 0 : index
    %46 = vector.load %arg10[%c0_24, %c0_25] : memref<3x8xbf16, #tpu.memory_space<vmem>>, vector<3x8xbf16>
    %cst_26 = arith.constant dense<0.000000e+00> : vector<2x8xf32>
    %47 = tpu.matmul %45, %46, %cst_26 {dimension_numbers = #tpu.dot_dimension_numbers<[1], [0], [0], [1], [0, 0, 1, 1], [], []>} : vector<2x3xbf16>, vector<3x8xbf16>, vector<2x8xf32> -> vector<2x8xf32>
    %c0_27 = arith.constant 0 : index
    %c0_28 = arith.constant 0 : index
    %48 = vector.load %arg11[%c0_27, %c0_28] : memref<1x8xf32, #tpu.memory_space<vmem>>, vector<1x8xf32>
    %49 = vector.broadcast %48 : vector<1x8xf32> to vector<2x8xf32>
    %50 = arith.addf %47, %49 : vector<2x8xf32>
    %51 = arith.truncf %50 : vector<2x8xf32> to vector<2x8xbf16>
    %c0_29 = arith.constant 0 : index
    %c0_30 = arith.constant 0 : index
    %52 = vector.load %arg12[%c0_29, %c0_30] : memref<8x32xbf16, #tpu.memory_space<vmem>>, vector<8x32xbf16>
    %cst_31 = arith.constant dense<0.000000e+00> : vector<2x32xf32>
    %53 = tpu.matmul %51, %52, %cst_31 {dimension_numbers = #tpu.dot_dimension_numbers<[1], [0], [0], [1], [0, 0, 1, 1], [], []>} : vector<2x8xbf16>, vector<8x32xbf16>, vector<2x32xf32> -> vector<2x32xf32>
    %54 = arith.truncf %44 : vector<2x288xf32> to vector<2x288xbf16>
    %c0_32 = arith.constant 0 : index
    %c0_33 = arith.constant 0 : index
    %55 = vector.load %arg13[%c0_32, %c0_33] : memref<288x32xbf16, #tpu.memory_space<vmem>>, vector<288x32xbf16>
    %cst_34 = arith.constant dense<0.000000e+00> : vector<2x32xf32>
    %56 = tpu.matmul %54, %55, %cst_34 {dimension_numbers = #tpu.dot_dimension_numbers<[1], [0], [0], [1], [0, 0, 1, 1], [], []>} : vector<2x288xbf16>, vector<288x32xbf16>, vector<2x32xf32> -> vector<2x32xf32>
    %57 = arith.addf %53, %56 : vector<2x32xf32>
    %c0_35 = arith.constant 0 : index
    %c0_36 = arith.constant 0 : index
    %58 = vector.load %arg14[%c0_35, %c0_36] : memref<1x32xf32, #tpu.memory_space<vmem>>, vector<1x32xf32>
    %59 = vector.broadcast %58 : vector<1x32xf32> to vector<2x32xf32>
    %60 = arith.addf %57, %59 : vector<2x32xf32>
    %cst_37 = arith.constant 0.000000e+00 : f32
    %61 = vector.broadcast %cst_37 : f32 to vector<2x32xf32>
    %62 = arith.maximumf %60, %61 : vector<2x32xf32>
    %63 = arith.truncf %62 : vector<2x32xf32> to vector<2x32xbf16>
    %c0_38 = arith.constant 0 : index
    %c0_39 = arith.constant 0 : index
    %64 = vector.load %arg15[%c0_38, %c0_39] : memref<32x16xbf16, #tpu.memory_space<vmem>>, vector<32x16xbf16>
    %cst_40 = arith.constant dense<0.000000e+00> : vector<2x16xf32>
    %65 = tpu.matmul %63, %64, %cst_40 {dimension_numbers = #tpu.dot_dimension_numbers<[1], [0], [0], [1], [0, 0, 1, 1], [], []>} : vector<2x32xbf16>, vector<32x16xbf16>, vector<2x16xf32> -> vector<2x16xf32>
    %c0_41 = arith.constant 0 : index
    %c0_42 = arith.constant 0 : index
    %66 = vector.load %arg16[%c0_41, %c0_42] : memref<1x16xf32, #tpu.memory_space<vmem>>, vector<1x16xf32>
    %67 = vector.broadcast %66 : vector<1x16xf32> to vector<2x16xf32>
    %68 = arith.addf %65, %67 : vector<2x16xf32>
    %c0_43 = arith.constant 0 : index
    %c0_44 = arith.constant 0 : index
    %69 = vector.load %arg17[%c0_43, %c0_44] : memref<2x16xf32, #tpu.memory_space<vmem>>, vector<2x16xf32>
    tpu.vector_store %arg17[%c0_43, %c0_44], %68 {strides = array<i32>} : memref<2x16xf32, #tpu.memory_space<vmem>>, vector<2x16xf32>,
    return
  }
}

</mosaic_0001>

<bundles_post_ra>
// kernel: _lambda_.1
= control target key start
LH: loop header
LB: loop body
LE: loop exit
PB: predicated region body
PF: predicated region fallthrough
CT: control target
= control target key end

     0   :  { %s6648_s0 = inlined_call_operand.vmem [shape: bf16[18,729], index: 0, kind: input, shape index: {}]   ;;  %s6649_s1 = inlined_call_operand.vmem [shape: f32[18,648], index: 1, kind: input, shape index: {}]   ;;  %s6650_s2 = inlined_call_operand.vmem [shape: f32[18,288], index: 2, kind: input, shape index: {}]   ;;  %s6651_s3 = inlined_call_operand.vmem [shape: bf16[2,3], index: 3, kind: input, shape index: {}]   ;;  %s6652_s4 = inlined_call_operand.vmem [shape: bf16[729,648], index: 4, kind: input, shape index: {}]   ;;  %s6653_s5 = inlined_call_operand.vmem [shape: f32[1,648], index: 5, kind: input, shape index: {}]   ;;  %s6654_s6 = inlined_call_operand.vmem [shape: bf16[648,144], index: 6, kind: input, shape index: {}]   ;;  %s6655_s7 = inlined_call_operand.vmem [shape: f32[1,144], index: 7, kind: input, shape index: {}]   ;;  %s6656_s8 = inlined_call_operand.vmem [shape: bf16[144,288], index: 8, kind: input, shape index: {}]   ;;  %s6657_s9 = inlined_call_operand.vmem [shape: f32[1,288], index: 9, kind: input, shape index: {}]   ;;  %s6658_s10 = inlined_call_operand.vmem [shape: bf16[3,8], index: 10, kind: input, shape index: {}]   ;;  %s6659_s11 = inlined_call_operand.vmem [shape: f32[1,8], index: 11, kind: input, shape index: {}]   ;;  %s6660_s12 = inlined_call_operand.vmem [shape: bf16[8,32], index: 12, kind: input, shape index: {}]   ;;  %s6661_s13 = inlined_call_operand.vmem [shape: bf16[288,32], index: 13, kind: input, shape index: {}]   ;;  %s6662_s14 = inlined_call_operand.vmem [shape: f32[1,32], index: 14, kind: input, shape index: {}]   ;;  %s6663_s15 = inlined_call_operand.vmem [shape: bf16[32,16], index: 15, kind: input, shape index: {}]   ;;  %s6664_s16 = inlined_call_operand.vmem [shape: f32[1,16], index: 16, kind: input, shape index: {}]   ;;  %s6665_s17 = inlined_call_operand.hbm [shape: f32[2,16], index: 17, kind: output, shape index: {}]  }
   0x1   :  { %6668 = sst [smem:[#allocation5_spill]] %s6648_s0 }
   0x2   :  { %6669 = sst [smem:[#allocation6_spill]] %s6649_s1 }
   0x3   :  { %v4355_v0 = vld [vmem:[%s6652_s4 + $0x154] ss:$24 sps:$4 sm:$0xff]   ;;  %v4357_v1 = vld [vmem:[%s6652_s4 + $0x150] ss:$24 sps:$4 sm:$0xff]   ;;  %v4361_v4 = vld [vmem:[%s6652_s4 + $0x124] ss:$24 sps:$4 sm:$0xff]  }
   0x4   :  { %1827 = vmatprep.subr.bf16.mxu0 %v4355_v0  ;;  %v4358_v2 = vld [vmem:[%s6652_s4 + $0x454] ss:$24 sps:$4 sm:$0xff]   ;;  %v4360_v3 = vld [vmem:[%s6652_s4 + $0x450] ss:$24 sps:$4 sm:$0xff]   ;;  %v4363_v5 = vld [vmem:[%s6652_s4 + $0x120] ss:$24 sps:$4 sm:$0xff]  }
   0x5   :  { %1828 = vmatpush1.bf16.msra.mxu0 %v4357_v1  ;;  %1878 = vmatprep.subr.bf16.mxu1 %v4358_v2  ;;  %v4364_v6 = vld [vmem:[%s6652_s4 + $0x424] ss:$24 sps:$4 sm:$0xff]   ;;  %v4366_v7 = vld [vmem:[%s6652_s4 + $0x420] ss:$24 sps:$4 sm:$0xff]   ;;  %v4367_v8 = vld [vmem:[%s6652_s4 + $0xf4] ss:$24 sps:$4 sm:$0xff]  }
   0x6   :  { %1879 = vmatpush1.bf16.msra.mxu1 %v4360_v3  ;;  %1829 = vmatprep.subr.bf16.mxu0 %v4361_v4  ;;  %v4369_v9 = vld [vmem:[%s6652_s4 + $0xf0] ss:$24 sps:$4 sm:$0xff]   ;;  %v4370_v10 = vld [vmem:[%s6652_s4 + $0x3f4] ss:$24 sps:$4 sm:$0xff]   ;;  %v4373_v11 = vld [vmem:[%s6652_s4 + $0xc4] ss:$24 sps:$4 sm:$0xff]  }
   0x7   :  { %1880 = vmatprep.subr.bf16.mxu1 %v4364_v6  ;;  %v4372_v12 = vld [vmem:[%s6652_s4 + $0x3f0] ss:$24 sps:$4 sm:$0xff]   ;;  %v4376_v13 = vld [vmem:[%s6652_s4 + $0x3c4] ss:$24 sps:$4 sm:$0xff]   ;;  %v4375_v14 = vld [vmem:[%s6652_s4 + $0xc0] ss:$24 sps:$4 sm:$0xff]  }
   0x8   :  { %v4379_v15 = vld [vmem:[%s6652_s4 + $0x94] ss:$24 sps:$4 sm:$0xff]   ;;  %v4378_v16 = vld [vmem:[%s6652_s4 + $0x3c0] ss:$24 sps:$4 sm:$0xff]   ;;  %v4381_v18 = vld [vmem:[%s6652_s4 + $0x90] ss:$24 sps:$4 sm:$0xff]  }
   0x9   :  { %1830 = vmatpush1.bf16.msra.mxu0 %v4363_v5  ;;  %v4382_v17 = vld [vmem:[%s6652_s4 + $0x394] ss:$24 sps:$4 sm:$0xff]   ;;  %v4385_v19 = vld [vmem:[%s6652_s4 + $0x64] ss:$24 sps:$4 sm:$0xff]   ;;  %v4384_v20 = vld [vmem:[%s6652_s4 + $0x390] ss:$24 sps:$4 sm:$0xff]  }
   0xa   :  { %1831 = vmatprep.subr.bf16.mxu0 %v4367_v8  ;;  %1881 = vmatpush1.bf16.msra.mxu1 %v4366_v7  ;;  %v4388_v21 = vld [vmem:[%s6652_s4 + $0x364] ss:$24 sps:$4 sm:$0xff]   ;;  %v4387_v22 = vld [vmem:[%s6652_s4 + $0x60] ss:$24 sps:$4 sm:$0xff]   ;;  %v4391_v23 = vld [vmem:[%s6652_s4 + $0x34] ss:$24 sps:$4 sm:$0xff]  }
   0xb   :  { %1882 = vmatprep.subr.bf16.mxu1 %v4370_v10  ;;  %v4390_v24 = vld [vmem:[%s6652_s4 + $0x360] ss:$24 sps:$4 sm:$0xff]   ;;  %v4394_v25 = vld [vmem:[%s6652_s4 + $0x334] ss:$24 sps:$4 sm:$0xff]   ;;  %v4393_v26 = vld [vmem:[%s6652_s4 + $0x30] ss:$24 sps:$4 sm:$0xff]  }
   0xc   :  { %v4397_v27 = vld [vmem:[%s6652_s4 + $0x4] ss:$24 sps:$4 sm:$0xff]   ;;  %v4396_v28 = vld [vmem:[%s6652_s4 + $0x330] ss:$24 sps:$4 sm:$0xff]   ;;  %v4399_v30 = vld [vmem:[%s6652_s4] ss:$24 sps:$4 sm:$0xff]  }
   0xd   :  { %1832 = vmatpush1.bf16.msra.mxu0 %v4369_v9  ;;  %v4400_v29 = vld [vmem:[%s6652_s4 + $0x304] ss:$24 sps:$4 sm:$0xff]   ;;  %v4403_v31 = vld [vmem:[%s6652_s4 + $0x2d4] ss:$24 sps:$4 sm:$0xff]   ;;  %v4402_v32 = vld [vmem:[%s6652_s4 + $0x300] ss:$24 sps:$4 sm:$0xff]  }
   0xe   :  { %1833 = vmatprep.subr.bf16.mxu0 %v4373_v11  ;;  %1883 = vmatpush1.bf16.msra.mxu1 %v4372_v12  ;;  %v4406_v33 = vld [vmem:[%s6652_s4 + $0x5d4] ss:$24 sps:$4 sm:$0xff]   ;;  %v4405_v34 = vld [vmem:[%s6652_s4 + $0x2d0] ss:$24 sps:$4 sm:$0xff]   ;;  %v4409_v35 = vld [vmem:[%s6652_s4 + $0x2a4] ss:$24 sps:$4 sm:$0xff]  }
   0xf   :  { %1884 = vmatprep.subr.bf16.mxu1 %v4376_v13  ;;  %v4408_v36 = vld [vmem:[%s6652_s4 + $0x5d0] ss:$24 sps:$4 sm:$0xff]   ;;  %v4412_v37 = vld [vmem:[%s6652_s4 + $0x5a4] ss:$24 sps:$4 sm:$0xff]   ;;  %v4411_v38 = vld [vmem:[%s6652_s4 + $0x2a0] ss:$24 sps:$4 sm:$0xff]  }
  0x10   :  { %v4415_v39 = vld [vmem:[%s6652_s4 + $0x274] ss:$24 sps:$4 sm:$0xff]   ;;  %v4414_v40 = vld [vmem:[%s6652_s4 + $0x5a0] ss:$24 sps:$4 sm:$0xff]   ;;  %v4417_v42 = vld [vmem:[%s6652_s4 + $0x270] ss:$24 sps:$4 sm:$0xff]  }
  0x11   :  { %1834 = vmatpush1.bf16.msra.mxu0 %v4375_v14  ;;  %v4418_v41 = vld [vmem:[%s6652_s4 + $0x574] ss:$24 sps:$4 sm:$0xff]   ;;  %v4421_v43 = vld [vmem:[%s6652_s4 + $0x244] ss:$24 sps:$4 sm:$0xff]   ;;  %v4420_v44 = vld [vmem:[%s6652_s4 + $0x570] ss:$24 sps:$4 sm:$0xff]  }
  0x12   :  { %1835 = vmatprep.subr.bf16.mxu0 %v4379_v15  ;;  %1885 = vmatpush1.bf16.msra.mxu1 %v4378_v16  ;;  %v4424_v45 = vld [vmem:[%s6652_s4 + $0x544] ss:$24 sps:$4 sm:$0xff]   ;;  %v4423_v46 = vld [vmem:[%s6652_s4 + $0x240] ss:$24 sps:$4 sm:$0xff]   ;;  %s6670_s0 = sld [smem:[#allocation5_spill]]  ;;  %vm1805_vm0 = vcmask 1043456  }
  0x13   :  { %1886 = vmatprep.subr.bf16.mxu1 %v4382_v17  ;;  %v4427_v48 = vld [vmem:[%s6652_s4 + $0x214] ss:$24 sps:$4 sm:$0xff]   ;;  %v4426_v49 = vld [vmem:[%s6652_s4 + $0x540] ss:$24 sps:$4 sm:$0xff]   ;;  %v4429_v52 = vld [vmem:[%s6652_s4 + $0x210] ss:$24 sps:$4 sm:$0xff]  }
  0x14   :  { %v4430_v50 = vld [vmem:[%s6652_s4 + $0x514] ss:$24 sps:$4 sm:$0xff]   ;;  %v4433_v53 = vld [vmem:[%s6652_s4 + $0x1e4] ss:$24 sps:$4 sm:$0xff]   ;;  %v4432_v54 = vld [vmem:[%s6652_s4 + $0x510] ss:$24 sps:$4 sm:$0xff]  }
  0x15   :  { %1836 = vmatpush1.bf16.msra.mxu0 %v4381_v18  ;;  %v4436_v55 = vld [vmem:[%s6652_s4 + $0x4e4] ss:$24 sps:$4 sm:$0xff]   ;;  %v4435_v56 = vld [vmem:[%s6652_s4 + $0x1e0] ss:$24 sps:$4 sm:$0xff]   ;;  %v4439_v57 = vld [vmem:[%s6652_s4 + $0x1b4] ss:$24 sps:$4 sm:$0xff]  }
  0x16   :  { %1837 = vmatprep.subr.bf16.mxu0 %v4385_v19  ;;  %1887 = vmatpush1.bf16.msra.mxu1 %v4384_v20  ;;  %v4438_v58 = vld [vmem:[%s6652_s4 + $0x4e0] ss:$24 sps:$4 sm:$0xff]   ;;  %v4442_v59 = vld [vmem:[%s6652_s4 + $0x4b4] ss:$24 sps:$4 sm:$0xff]   ;;  %v4441_v60 = vld [vmem:[%s6652_s4 + $0x1b0] ss:$24 sps:$4 sm:$0xff]  }
  0x17   :  { %1888 = vmatprep.subr.bf16.mxu1 %v4388_v21  ;;  %v4445_v61 = vld [vmem:[%s6652_s4 + $0x184] ss:$24 sps:$4 sm:$0xff]   ;;  %v4444_v62 = vld [vmem:[%s6652_s4 + $0x4b0] ss:$24 sps:$4 sm:$0xff]   ;;  %v4447_v0 = vld [vmem:[%s6652_s4 + $0x180] ss:$24 sps:$4 sm:$0xff]  }
  0x18   :  { %v5229_v47 = vld [vmem:[%s6670_s0 + $0x4] ss:$24 sps:$4 sm:$0xff]   ;;  %v4456_v1 = vld [vmem:[%s6652_s4 + $0x754] ss:$24 sps:$4 sm:$0xff]   ;;  %v4452_v2 = vld [vmem:[%s6652_s4 + $0x480] ss:$24 sps:$4 sm:$0xff]  }
  0x19   :  { %1838 = vmatpush1.bf16.msra.mxu0 %v4387_v22  ;;  %1859 = vmatprep.mubr.bf16.mxu0 %v5229_v47  ;;  %v5244_v51 = vld [vmem:[%s6670_s0 + $0xc] ss:$24 sps:$4 sm:$0xff]   ;;  %v5295_v3 = vld [vmem:[%s6670_s0] ss:$24 sps:$4 sm:$0xff]   ;;  %v4462_v4 = vld [vmem:[%s6652_s4 + $0x15c] ss:$24 sps:$4 sm:$0xff]  }
  0x1a   :  { %1839 = vmatprep.subr.bf16.mxu0 %v4391_v23  ;;  %1889 = vmatpush1.bf16.msra.mxu1 %v4390_v24  ;;  %v4448_v63 = vld [vmem:[%s6652_s4 + $0x484] ss:$24 sps:$4 sm:$0xff]   ;;  %v4454_v5 = vld [vmem:[%s6652_s4 + $0x750] ss:$24 sps:$4 sm:$0xff]   ;;  %v4463_v10 = vld [vmem:[%s6652_s4 + $0x720] ss:$24 sps:$4 sm:$0xff]  }
  0x1b   :  { %1890 = vmatprep.subr.bf16.mxu1 %v4394_v25  ;;  %1910 = vmatprep.mubr.bf16.mxu1 %v5244_v51  ;;  %v5306_v6 = vld [vmem:[%s6670_s0 + $0x8] ss:$24 sps:$4 sm:$0xff]   ;;  %v4465_v7 = vld [vmem:[%s6652_s4 + $0x724] ss:$24 sps:$4 sm:$0xff]   ;;  %v4460_v8 = vld [vmem:[%s6652_s4 + $0x158] ss:$24 sps:$4 sm:$0xff]  }
  0x1c   :  { %v4468_v9 = vld [vmem:[%s6652_s4 + $0x12c] ss:$24 sps:$4 sm:$0xff]   ;;  %v4466_v12 = vld [vmem:[%s6652_s4 + $0x128] ss:$24 sps:$4 sm:$0xff]   ;;  %v4474_v13 = vld [vmem:[%s6652_s4 + $0xfc] ss:$24 sps:$4 sm:$0xff]  }
  0x1d   :  { %1840 = vmatpush1.bf16.msra.mxu0 %v4393_v26  ;;  %v4471_v11 = vld [vmem:[%s6652_s4 + $0x6f4] ss:$24 sps:$4 sm:$0xff]   ;;  %v4469_v14 = vld [vmem:[%s6652_s4 + $0x6f0] ss:$24 sps:$4 sm:$0xff]   ;;  %v4477_v15 = vld [vmem:[%s6652_s4 + $0x6c4] ss:$24 sps:$4 sm:$0xff]  }
  0x1e   :  { %1841 = vmatprep.subr.bf16.mxu0 %v4397_v27  ;;  %1891 = vmatpush1.bf16.msra.mxu1 %v4396_v28  ;;  %v4472_v16 = vld [vmem:[%s6652_s4 + $0xf8] ss:$24 sps:$4 sm:$0xff]   ;;  %v4480_v18 = vld [vmem:[%s6652_s4 + $0xcc] ss:$24 sps:$4 sm:$0xff]   ;;  %v4478_v23 = vld [vmem:[%s6652_s4 + $0xc8] ss:$24 sps:$4 sm:$0xff]  }
  0x1f   :  { %1892 = vmatprep.subr.bf16.mxu1 %v4400_v29  ;;  %v64_v17 = vld [vmem:[%s6670_s0 + $0x30] sm:$0x11]  ;;  %v4475_v21 = vld [vmem:[%s6652_s4 + $0x6c0] ss:$24 sps:$4 sm:$0xff]   ;;  %v4489_v29 = vld [vmem:[%s6652_s4 + $0x664] ss:$24 sps:$4 sm:$0xff]  }
  0x20   :  { %v5346_v19 = vcombine.high %v64_v17, %v64_v17  ;;  %v5348_v20 = vcombine.low %v64_v17, %v64_v17  ;;  %v4483_v22 = vld [vmem:[%s6652_s4 + $0x694] ss:$24 sps:$4 sm:$0xff]   ;;  %v65_v24 = vld [vmem:[%s6670_s0 + $0x38] sm:$0x11]  ;;  %v4481_v28 = vld [vmem:[%s6652_s4 + $0x690] ss:$24 sps:$4 sm:$0xff]  }
  0x21   :  { %1842 = vmatpush1.bf16.msra.mxu0 %v4399_v30  ;;  %v4486_v25 = vld [vmem:[%s6652_s4 + $0x9c] ss:$24 sps:$4 sm:$0xff]   ;;  %v5367_v26 = vcombine.high %v65_v24, %v65_v24  ;;  %v5369_v27 = vcombine.low %v65_v24, %v65_v24  ;;  %v4484_v30 = vld [vmem:[%s6652_s4 + $0x98] ss:$24 sps:$4 sm:$0xff]   ;;  %vm1798_vm1 = vcmask 728064   ;;  %vm1806_vm2 = vcmask 1044480  }
  0x22   :  { %1843 = vmatprep.subr.bf16.mxu0 %v4403_v31  ;;  %1893 = vmatpush1.bf16.msra.mxu1 %v4402_v32  ;;  %v4492_v31 = vld [vmem:[%s6652_s4 + $0x6c] ss:$24 sps:$4 sm:$0xff]   ;;  %v4487_v32 = vld [vmem:[%s6652_s4 + $0x660] ss:$24 sps:$4 sm:$0xff]  }
  0x23   :  { %1894 = vmatprep.subr.bf16.mxu1 %v4406_v33  ;;  %v4495_v33 = vld [vmem:[%s6652_s4 + $0x634] ss:$24 sps:$4 sm:$0xff]   ;;  %v4557_v24 = vld [vmem:[%s6652_s4 + $0x188] ss:$24 sps:$4 sm:$0xff]  }
  0x24   :  { %v4556_v17 = vld [vmem:[%s6652_s4 + $0x42c] ss:$24 sps:$4 sm:$0xff]  }
  0x25   :  { %1844 = vmatpush2.bf16.msra.mxu0 %v4405_v34  ;;  %v5395_v34 = vld [vmem:[%s6670_s0 + $0x14] ss:$24 sps:$4 sm:$0xff]  }
  0x26   :  { %1845 = vmatprep.subr.bf16.mxu0 %v4409_v35  ;;  %1895 = vmatpush2.bf16.msra.mxu1 %v4408_v36  ;;  %v4490_v35 = vld [vmem:[%s6652_s4 + $0x68] ss:$24 sps:$4 sm:$0xff]   ;;  %v4498_v36 = vld [vmem:[%s6652_s4 + $0x3c] ss:$24 sps:$4 sm:$0xff]  }
  0x27   :  { %1896 = vmatprep.subr.bf16.mxu1 %v4412_v37  ;;  %v4990_v37 = vmov 65535  }
  0x29   :  { %1846 = vmatpush2.bf16.msra.mxu0 %v4411_v38  ;;  %v1807_v38 = vsel %vm1805_vm0, 4294967295, %v4990_v37 }
  0x2a   :  { %1847 = vmatprep.subr.bf16.mxu0 %v4415_v39  ;;  %1897 = vmatpush2.bf16.msra.mxu1 %v4414_v40  ;;  %v4493_v39 = vld [vmem:[%s6652_s4 + $0x630] ss:$24 sps:$4 sm:$0xff]   ;;  %v4501_v40 = vld [vmem:[%s6652_s4 + $0x604] ss:$24 sps:$4 sm:$0xff]  }
  0x2b   :  { %1898 = vmatprep.subr.bf16.mxu1 %v4418_v41  ;;  %v4507_v41 = vld [vmem:[%s6652_s4 + $0x874] ss:$24 sps:$4 sm:$0x1f]  }
  0x2d   :  { %1848 = vmatpush2.bf16.msra.mxu0 %v4417_v42  ;;  %v4496_v42 = vld [vmem:[%s6652_s4 + $0x38] ss:$24 sps:$4 sm:$0xff]  }
  0x2e   :  { %1849 = vmatprep.subr.bf16.mxu0 %v4421_v43  ;;  %1899 = vmatpush2.bf16.msra.mxu1 %v4420_v44  ;;  %v5419_v43 = vsel %vm1806_vm2, %v1807_v38, 0  ;;  %v4504_v44 = vld [vmem:[%s6652_s4 + $0xc] ss:$24 sps:$4 sm:$0xff]   ;;  %v4579_v38 = vld [vmem:[%s6652_s4 + $0x6fc] ss:$24 sps:$4 sm:$0xff]  }
  0x2f   :  { %1900 = vmatprep.subr.bf16.mxu1 %v4424_v45  ;;  %v4499_v45 = vld [vmem:[%s6652_s4 + $0x600] ss:$24 sps:$4 sm:$0xff]  }
  0x31   :  { %1850 = vmatpush2.bf16.msra.mxu0 %v4423_v46  ;;  %v4505_v46 = vld [vmem:[%s6652_s4 + $0x870] ss:$24 sps:$4 sm:$0x1f]  }
  0x32   :  { %1851 = vmatprep.subr.bf16.mxu0 %v4427_v48  ;;  %1901 = vmatpush2.bf16.msra.mxu1 %v4426_v49  ;;  %v4502_v48 = vld [vmem:[%s6652_s4 + $0x8] ss:$24 sps:$4 sm:$0xff]   ;;  %v4510_v49 = vld [vmem:[%s6652_s4 + $0x2dc] ss:$24 sps:$4 sm:$0xff]  }
  0x33   :  { %1902 = vmatprep.subr.bf16.mxu1 %v4430_v50  ;;  %v1810_v50 = vand.u32 %v4505_v46, %v5419_v43  ;;  %v4586_v46 = vld [vmem:[%s6652_s4 + $0x338] ss:$24 sps:$4 sm:$0xff]  }
  0x35   :  { %1852 = vmatpush2.bf16.msra.mxu0 %v4429_v52  ;;  %v4513_v52 = vld [vmem:[%s6652_s4 + $0x844] ss:$24 sps:$4 sm:$0xff]  }
  0x36   :  { %1853 = vmatprep.subr.bf16.mxu0 %v4433_v53  ;;  %1903 = vmatpush2.bf16.msra.mxu1 %v4432_v54  ;;  %v4508_v53 = vld [vmem:[%s6652_s4 + $0x2d8] ss:$24 sps:$4 sm:$0xff]   ;;  %v4516_v54 = vld [vmem:[%s6652_s4 + $0x2ac] ss:$24 sps:$4 sm:$0xff]  }
  0x37   :  { %1904 = vmatprep.subr.bf16.mxu1 %v4436_v55  ;;  %v4511_v55 = vld [vmem:[%s6652_s4 + $0x840] ss:$24 sps:$4 sm:$0xff]  }
  0x39   :  { %1854 = vmatpush2.bf16.msra.mxu0 %v4435_v56  ;;  %v4519_v56 = vld [vmem:[%s6652_s4 + $0x814] ss:$24 sps:$4 sm:$0xff]  }
  0x3a   :  { %1855 = vmatprep.subr.bf16.mxu0 %v4439_v57  ;;  %1905 = vmatpush2.bf16.msra.mxu1 %v4438_v58  ;;  %v4514_v57 = vld [vmem:[%s6652_s4 + $0x2a8] ss:$24 sps:$4 sm:$0xff]   ;;  %v4523_v58 = vld [vmem:[%s6652_s4 + $0x27c] ss:$24 sps:$4 sm:$0xff]  }
  0x3b   :  { %1906 = vmatprep.subr.bf16.mxu1 %v4442_v59  ;;  %v4517_v59 = vld [vmem:[%s6652_s4 + $0x810] ss:$24 sps:$4 sm:$0xff]  }
  0x3d   :  { %1856 = vmatpush2.bf16.msra.mxu0 %v4441_v60  ;;  %v4527_v60 = vld [vmem:[%s6652_s4 + $0x7e4] ss:$24 sps:$4 sm:$0xff]  }
  0x3e   :  { %1857 = vmatprep.subr.bf16.mxu0 %v4445_v61  ;;  %1907 = vmatpush2.bf16.msra.mxu1 %v4444_v62  ;;  %v4521_v61 = vld [vmem:[%s6652_s4 + $0x278] ss:$24 sps:$4 sm:$0xff]   ;;  %v4530_v62 = vld [vmem:[%s6652_s4 + $0x24c] ss:$24 sps:$4 sm:$0xff]  }
  0x3f   :  { %1908 = vmatprep.subr.bf16.mxu1 %v4448_v63  ;;  %v4525_v63 = vld [vmem:[%s6652_s4 + $0x7e0] ss:$24 sps:$4 sm:$0xff]  }
  0x41   :  { %1858 = vmatpush2.bf16.msra.mxu0 %v4447_v0  ;;  %v4534_v0 = vld [vmem:[%s6652_s4 + $0x7b4] ss:$24 sps:$4 sm:$0xff]  }
  0x42   :  { %1929 = vmatprep.subr.bf16.mxu0 %v4456_v1  ;;  %1909 = vmatpush2.bf16.msra.mxu1 %v4452_v2  ;;  %v4528_v1 = vld [vmem:[%s6652_s4 + $0x248] ss:$24 sps:$4 sm:$0xff]   ;;  %v4538_v2 = vld [vmem:[%s6652_s4 + $0x21c] ss:$24 sps:$4 sm:$0xff]  }
  0x43   :  { %1980 = vmatprep.subr.bf16.mxu1 %v4462_v4  ;;  %v4532_v4 = vld [vmem:[%s6652_s4 + $0x7b0] ss:$24 sps:$4 sm:$0xff]  }
  0x44   :  { %1860 = vmatmul.mubr.bf16.vlgmr.msra.gmra.mxu0 %v5295_v3 }
  0x45   :  { %1930 = vmatpush1.bf16.msra.mxu0 %v4454_v5  ;;  %1911 = vmatmul.mubr.bf16.vlgmr.msra.gmra.mxu1 %v5306_v6  ;;  %v4541_v5 = vld [vmem:[%s6652_s4 + $0x784] ss:$24 sps:$4 sm:$0xff]  }
  0x46   :  { %1931 = vmatprep.subr.bf16.mxu0 %v4465_v7  ;;  %1981 = vmatpush1.bf16.msra.mxu1 %v4460_v8  ;;  %v4536_v7 = vld [vmem:[%s6652_s4 + $0x218] ss:$24 sps:$4 sm:$0xff]   ;;  %v4544_v8 = vld [vmem:[%s6652_s4 + $0x1ec] ss:$24 sps:$4 sm:$0xff]  }
  0x47   :  { %1982 = vmatprep.subr.bf16.mxu1 %v4468_v9  ;;  %1869 = vmatprep.mubr.bf16.mxu0 %v5346_v19  ;;  %v4539_v9 = vld [vmem:[%s6652_s4 + $0x780] ss:$24 sps:$4 sm:$0xff]  }
  0x48   :  { %1920 = vmatprep.mubr.bf16.mxu1 %v5367_v26 }
  0x49   :  { %1932 = vmatpush1.bf16.msra.mxu0 %v4463_v10  ;;  %v4542_v10 = vld [vmem:[%s6652_s4 + $0x1e8] ss:$24 sps:$4 sm:$0xff]  }
  0x4a   :  { %1933 = vmatprep.subr.bf16.mxu0 %v4471_v11  ;;  %1983 = vmatpush1.bf16.msra.mxu1 %v4466_v12  ;;  %v4550_v11 = vld [vmem:[%s6652_s4 + $0x45c] ss:$24 sps:$4 sm:$0xff]   ;;  %v66_v12 = vld [vmem:[%s6670_s0 + $0x40] sm:$0x11] }
  0x4b   :  { %1984 = vmatprep.subr.bf16.mxu1 %v4474_v13  ;;  %v5510_v13 = vld [vmem:[%s6670_s0 + $0x10] ss:$24 sps:$4 sm:$0xff]  }
  0x4c   :  { %1870 = vmatmul.mubr.bf16.gmra.mxu0 %v5348_v20 }
  0x4d   :  { %1934 = vmatpush1.bf16.msra.mxu0 %v4469_v14  ;;  %1921 = vmatmul.mubr.bf16.gmra.mxu1 %v5369_v27  ;;  %v4553_v14 = vld [vmem:[%s6652_s4 + $0x1bc] ss:$24 sps:$4 sm:$0xff]  }
  0x4e   :  { %1935 = vmatprep.subr.bf16.mxu0 %v4477_v15  ;;  %1985 = vmatpush1.bf16.msra.mxu1 %v4472_v16  ;;  %v4548_v15 = vld [vmem:[%s6652_s4 + $0x458] ss:$24 sps:$4 sm:$0xff]   ;;  %v5518_v16 = vcombine.high %v66_v12, %v66_v12 }
  0x4f   :  { %1986 = vmatprep.subr.bf16.mxu1 %v4480_v18  ;;  %2012 = vmatprep.mubr.bf16.mxu1 %v5229_v47  ;;  %v1813_v47 = vand.u32 %v4507_v41, %v5419_v43  ;;  %v4551_v18 = vld [vmem:[%s6652_s4 + $0x1b8] ss:$24 sps:$4 sm:$0xff]   ;;  %v4580_v41 = vld [vmem:[%s6652_s4 + $0x368] ss:$24 sps:$4 sm:$0xff]  }
  0x50   :  { %4141 = vmatprep.mubr.msk.bf16.mxu0 %vm1798_vm1, %v5395_v34 }
  0x51   :  { %1936 = vmatpush1.bf16.msra.mxu0 %v4475_v21  ;;  %v4559_v21 = vld [vmem:[%s6652_s4 + $0x18c] ss:$24 sps:$4 sm:$0xff]  }
  0x52   :  { %1937 = vmatprep.subr.bf16.mxu0 %v4483_v22  ;;  %1987 = vmatpush1.bf16.msra.mxu1 %v4478_v23  ;;  %v4554_v22 = vld [vmem:[%s6652_s4 + $0x428] ss:$24 sps:$4 sm:$0xff]   ;;  %v4564_v23 = vld [vmem:[%s6652_s4 + $0x3fc] ss:$24 sps:$4 sm:$0xff]  }
  0x53   :  { %1988 = vmatprep.subr.bf16.mxu1 %v4486_v25  ;;  %v5541_v25 = vcombine.low %v66_v12, %v66_v12  ;;  %v4625_v12 = vld [vmem:[%s6652_s4 + $0x818] ss:$24 sps:$4 sm:$0xff]  }
  0x55   :  { %1938 = vmatpush1.bf16.msra.mxu0 %v4481_v28  ;;  %v4567_v28 = vld [vmem:[%s6652_s4 + $0x75c] ss:$24 sps:$4 sm:$0xff]  }
  0x56   :  { %1939 = vmatprep.subr.bf16.mxu0 %v4489_v29  ;;  %1989 = vmatpush1.bf16.msra.mxu1 %v4484_v30  ;;  %v4562_v29 = vld [vmem:[%s6652_s4 + $0x3f8] ss:$24 sps:$4 sm:$0xff]   ;;  %v4570_v30 = vld [vmem:[%s6652_s4 + $0x3cc] ss:$24 sps:$4 sm:$0xff]  }
  0x57   :  { %1990 = vmatprep.subr.bf16.mxu1 %v4492_v31  ;;  %v4565_v31 = vld [vmem:[%s6652_s4 + $0x758] ss:$24 sps:$4 sm:$0xff]  }
  0x59   :  { %1940 = vmatpush1.bf16.msra.mxu0 %v4487_v32  ;;  %v4573_v32 = vld [vmem:[%s6652_s4 + $0x72c] ss:$24 sps:$4 sm:$0xff]  }
  0x5a   :  { %1941 = vmatprep.subr.bf16.mxu0 %v4495_v33  ;;  %1991 = vmatpush1.bf16.msra.mxu1 %v4490_v35  ;;  %v4568_v33 = vld [vmem:[%s6652_s4 + $0x3c8] ss:$24 sps:$4 sm:$0xff]   ;;  %v4576_v35 = vld [vmem:[%s6652_s4 + $0x39c] ss:$24 sps:$4 sm:$0xff]  }
  0x5b   :  { %1992 = vmatprep.subr.bf16.mxu1 %v4498_v36  ;;  %v4571_v36 = vld [vmem:[%s6652_s4 + $0x728] ss:$24 sps:$4 sm:$0xff]  }
  0x5d   :  { %1942 = vmatpush1.bf16.msra.mxu0 %v4493_v39  ;;  %v4577_v39 = vld [vmem:[%s6652_s4 + $0x6f8] ss:$24 sps:$4 sm:$0xff]  }
  0x5e   :  { %1943 = vmatprep.subr.bf16.mxu0 %v4501_v40  ;;  %1993 = vmatpush1.bf16.msra.mxu1 %v4496_v42  ;;  %v4585_v40 = vld [vmem:[%s6652_s4 + $0x6cc] ss:$24 sps:$4 sm:$0xff]   ;;  %v4588_v42 = vld [vmem:[%s6652_s4 + $0x33c] ss:$24 sps:$4 sm:$0xff]  }
  0x5f   :  { %1994 = vmatprep.subr.bf16.mxu1 %v4504_v44  ;;  %v4583_v44 = vld [vmem:[%s6652_s4 + $0x6c8] ss:$24 sps:$4 sm:$0xff]  }
  0x61   :  { %1944 = vmatpush1.bf16.msra.mxu0 %v4499_v45  ;;  %v4591_v45 = vld [vmem:[%s6652_s4 + $0x69c] ss:$24 sps:$4 sm:$0xff]  }
  0x62   :  { %1949 = vmatprep.subr.bf16.mxu0 %v1813_v47  ;;  %1995 = vmatpush1.bf16.msra.mxu1 %v4502_v48  ;;  %v4594_v47 = vld [vmem:[%s6652_s4 + $0x30c] ss:$24 sps:$4 sm:$0xff]  }
  0x63   :  { %1996 = vmatprep.subr.bf16.mxu1 %v4510_v49  ;;  %v4597_v48 = vld [vmem:[%s6652_s4 + $0x66c] ss:$24 sps:$4 sm:$0xff]   ;;  %v4592_v49 = vld [vmem:[%s6652_s4 + $0x308] ss:$24 sps:$4 sm:$0xff]  }
  0x65   :  { %1950 = vmatpush2.bf16.msra.mxu0 %v1810_v50  ;;  %v4600_v50 = vld [vmem:[%s6652_s4 + $0x5dc] ss:$24 sps:$4 sm:$0xff]  }
  0x66   :  { %1951 = vmatprep.subr.bf16.mxu0 %v4513_v52  ;;  %1997 = vmatpush2.bf16.msra.mxu1 %v4508_v53  ;;  %v4595_v52 = vld [vmem:[%s6652_s4 + $0x668] ss:$24 sps:$4 sm:$0xff]   ;;  %v4603_v53 = vld [vmem:[%s6652_s4 + $0x63c] ss:$24 sps:$4 sm:$0xff]  }
  0x67   :  { %1998 = vmatprep.subr.bf16.mxu1 %v4516_v54  ;;  %v4598_v54 = vld [vmem:[%s6652_s4 + $0x5d8] ss:$24 sps:$4 sm:$0xff]  }
  0x69   :  { %1952 = vmatpush2.bf16.msra.mxu0 %v4511_v55  ;;  %v4601_v55 = vld [vmem:[%s6652_s4 + $0x638] ss:$24 sps:$4 sm:$0xff]  }
  0x6a   :  { %1953 = vmatprep.subr.bf16.mxu0 %v4519_v56  ;;  %1999 = vmatpush2.bf16.msra.mxu1 %v4514_v57  ;;  %v4606_v56 = vld [vmem:[%s6652_s4 + $0x5ac] ss:$24 sps:$4 sm:$0xff]  }
  0x6b   :  { %2000 = vmatprep.subr.bf16.mxu1 %v4523_v58  ;;  %v4609_v57 = vld [vmem:[%s6652_s4 + $0x60c] ss:$24 sps:$4 sm:$0xff]   ;;  %v4615_v58 = vld [vmem:[%s6652_s4 + $0x87c] ss:$24 sps:$4 sm:$0x1f]  }
  0x6d   :  { %1954 = vmatpush2.bf16.msra.mxu0 %v4517_v59  ;;  %v4604_v59 = vld [vmem:[%s6652_s4 + $0x5a8] ss:$24 sps:$4 sm:$0xff]  }
  0x6e   :  { %1955 = vmatprep.subr.bf16.mxu0 %v4527_v60  ;;  %2001 = vmatpush2.bf16.msra.mxu1 %v4521_v61  ;;  %v4607_v60 = vld [vmem:[%s6652_s4 + $0x608] ss:$24 sps:$4 sm:$0xff]   ;;  %v4612_v61 = vld [vmem:[%s6652_s4 + $0x57c] ss:$24 sps:$4 sm:$0xff]  }
  0x6f   :  { %2002 = vmatprep.subr.bf16.mxu1 %v4530_v62  ;;  %v4613_v62 = vld [vmem:[%s6652_s4 + $0x878] ss:$24 sps:$4 sm:$0x1f]  }
  0x71   :  { %1956 = vmatpush2.bf16.msra.mxu0 %v4525_v63  ;;  %v1819_v63 = vand.u32 %v4615_v58, %v5419_v43  ;;  %v4682_v58 = vld [vmem:[%s6652_s4 + $0x40] ss:$24 sps:$4 sm:$0xff]  }
  0x72   :  { %1957 = vmatprep.subr.bf16.mxu0 %v4534_v0  ;;  %2003 = vmatpush2.bf16.msra.mxu1 %v4528_v1  ;;  %v4610_v0 = vld [vmem:[%s6652_s4 + $0x578] ss:$24 sps:$4 sm:$0xff]   ;;  %v4618_v1 = vld [vmem:[%s6652_s4 + $0x54c] ss:$24 sps:$4 sm:$0xff]  }
  0x73   :  { %2004 = vmatprep.subr.bf16.mxu1 %v4538_v2  ;;  %v1816_v2 = vand.u32 %v4613_v62, %v5419_v43  ;;  %v4688_v62 = vld [vmem:[%s6652_s4 + $0x10] ss:$24 sps:$4 sm:$0xff]  }
  0x75   :  { %1958 = vmatpush2.bf16.msra.mxu0 %v4532_v4  ;;  %v4621_v4 = vld [vmem:[%s6652_s4 + $0x84c] ss:$24 sps:$4 sm:$0xff]  }
  0x76   :  { %1959 = vmatprep.subr.bf16.mxu0 %v4541_v5  ;;  %2005 = vmatpush2.bf16.msra.mxu1 %v4536_v7  ;;  %v4616_v5 = vld [vmem:[%s6652_s4 + $0x548] ss:$24 sps:$4 sm:$0xff]   ;;  %v4624_v7 = vld [vmem:[%s6652_s4 + $0x51c] ss:$24 sps:$4 sm:$0xff]  }
  0x77   :  { %2006 = vmatprep.subr.bf16.mxu1 %v4544_v8  ;;  %v4619_v8 = vld [vmem:[%s6652_s4 + $0x848] ss:$24 sps:$4 sm:$0xff]  }
  0x79   :  { %1960 = vmatpush2.bf16.msra.mxu0 %v4539_v9  ;;  %v4627_v9 = vld [vmem:[%s6652_s4 + $0x81c] ss:$24 sps:$4 sm:$0xff]  }
  0x7a   :  { %2031 = vmatprep.subr.bf16.mxu0 %v4550_v11  ;;  %2007 = vmatpush2.bf16.msra.mxu1 %v4542_v10  ;;  %v4622_v10 = vld [vmem:[%s6652_s4 + $0x518] ss:$24 sps:$4 sm:$0xff]   ;;  %v4630_v11 = vld [vmem:[%s6652_s4 + $0x4ec] ss:$24 sps:$4 sm:$0xff]  }
  0x7b   :  { %2008 = vmatprep.subr.bf16.mxu1 %v4553_v14  ;;  %v4633_v14 = vld [vmem:[%s6652_s4 + $0x7ec] ss:$24 sps:$4 sm:$0xff]  }
  0x7c   :  { %1962 = vmatmul.mubr.bf16.vlgmr.msra.gmra.mxu0 %v5510_v13 }
  0x7d   :  { %2032 = vmatpush1.bf16.msra.mxu0 %v4548_v15  ;;  %4142 = vmatprep.mubr.msk.bf16.mxu0 %vm1798_vm1, %v5518_v16  ;;  %v4628_v15 = vld [vmem:[%s6652_s4 + $0x4e8] ss:$24 sps:$4 sm:$0xff]  }
  0x7e   :  { %2033 = vmatprep.subr.bf16.mxu0 %v4556_v17  ;;  %2009 = vmatpush2.bf16.msra.mxu1 %v4551_v18  ;;  %v4636_v17 = vld [vmem:[%s6652_s4 + $0x4bc] ss:$24 sps:$4 sm:$0xff]   ;;  %v4631_v18 = vld [vmem:[%s6652_s4 + $0x7e8] ss:$24 sps:$4 sm:$0xff]  }
  0x7f   :  { %2010 = vmatprep.subr.bf16.mxu1 %v4559_v21  ;;  %v4639_v21 = vld [vmem:[%s6652_s4 + $0x7bc] ss:$24 sps:$4 sm:$0xff]  }
  0x81   :  { %2034 = vmatpush1.bf16.msra.mxu0 %v4554_v22  ;;  %v4634_v22 = vld [vmem:[%s6652_s4 + $0x4b8] ss:$24 sps:$4 sm:$0xff]  }
  0x82   :  { %2035 = vmatprep.subr.bf16.mxu0 %v4564_v23  ;;  %2011 = vmatpush2.bf16.msra.mxu1 %v4557_v24  ;;  %v4642_v23 = vld [vmem:[%s6652_s4 + $0x48c] ss:$24 sps:$4 sm:$0xff]   ;;  %v4637_v24 = vld [vmem:[%s6652_s4 + $0x7b8] ss:$24 sps:$4 sm:$0xff]  }
  0x83   :  { %2082 = vmatprep.subr.bf16.mxu1 %v4567_v28  ;;  %v4645_v28 = vld [vmem:[%s6652_s4 + $0x78c] ss:$24 sps:$4 sm:$0xff]  }
  0x84   :  { %1972 = vmatmul.mubr.bf16.gmra.mxu0 %v5541_v25 }
  0x85   :  { %2036 = vmatpush1.bf16.msra.mxu0 %v4562_v29  ;;  %2063 = vmatprep.mubr.bf16.mxu0 %v5244_v51  ;;  %v4574_v51 = vld [vmem:[%s6652_s4 + $0x398] ss:$24 sps:$4 sm:$0xff]   ;;  %v4640_v29 = vld [vmem:[%s6652_s4 + $0x488] ss:$24 sps:$4 sm:$0xff]  }
  0x86   :  { %2013 = vmatmul.mubr.bf16.vlgmr.msra.gmra.mxu1 %v5295_v3  ;;  %2037 = vmatprep.subr.bf16.mxu0 %v4570_v30  ;;  %v4582_v3 = vld [vmem:[%s6652_s4 + $0x36c] ss:$24 sps:$4 sm:$0xff]  }
  0x87   :  { %2083 = vmatpush1.bf16.msra.mxu1 %v4565_v31  ;;  %2022 = vmatprep.mubr.bf16.mxu1 %v5346_v19  ;;  %v4648_v30 = vld [vmem:[%s6652_s4 + $0x164] ss:$24 sps:$4 sm:$0xff]   ;;  %v4643_v31 = vld [vmem:[%s6652_s4 + $0x788] ss:$24 sps:$4 sm:$0xff]  }
  0x88   :  { %2084 = vmatprep.subr.bf16.mxu1 %v4573_v32  ;;  %v4651_v32 = vld [vmem:[%s6652_s4 + $0x464] ss:$24 sps:$4 sm:$0xff]  }
  0x89   :  { %2038 = vmatpush1.bf16.msra.mxu0 %v4568_v33  ;;  %v4646_v33 = vld [vmem:[%s6652_s4 + $0x160] ss:$24 sps:$4 sm:$0xff]  }
  0x8a   :  { %2039 = vmatprep.subr.bf16.mxu0 %v4576_v35  ;;  %v4654_v35 = vld [vmem:[%s6652_s4 + $0x134] ss:$24 sps:$4 sm:$0xff]  }
  0x8b   :  { %2085 = vmatpush1.bf16.msra.mxu1 %v4571_v36  ;;  %v4649_v36 = vld [vmem:[%s6652_s4 + $0x460] ss:$24 sps:$4 sm:$0xff]  }
  0x8c   :  { %2086 = vmatprep.subr.bf16.mxu1 %v4579_v38  ;;  %v4657_v38 = vld [vmem:[%s6652_s4 + $0x434] ss:$24 sps:$4 sm:$0xff]  }
  0x8d   :  { %2040 = vmatpush1.bf16.msra.mxu0 %v4574_v51  ;;  %v4652_v51 = vld [vmem:[%s6652_s4 + $0x130] ss:$24 sps:$4 sm:$0xff]  }
  0x8e   :  { %2041 = vmatprep.subr.bf16.mxu0 %v4582_v3  ;;  %2023 = vmatmul.mubr.bf16.gmra.mxu1 %v5348_v20  ;;  %v4660_v3 = vld [vmem:[%s6652_s4 + $0x104] ss:$24 sps:$4 sm:$0xff]  }
  0x8f   :  { %2087 = vmatpush1.bf16.msra.mxu1 %v4577_v39  ;;  %4143 = vmatprep.mubr.msk.bf16.mxu1 %vm1798_vm1, %v5395_v34  ;;  %v4589_v34 = vld [vmem:[%s6652_s4 + $0x698] ss:$24 sps:$4 sm:$0xff]   ;;  %v4663_v39 = vld [vmem:[%s6652_s4 + $0x404] ss:$24 sps:$4 sm:$0xff]  }
  0x90   :  { %2088 = vmatprep.subr.bf16.mxu1 %v4585_v40  ;;  %v4666_v40 = vld [vmem:[%s6652_s4 + $0xd4] ss:$24 sps:$4 sm:$0xff]  }
  0x91   :  { %2042 = vmatpush1.bf16.msra.mxu0 %v4580_v41  ;;  %v4661_v41 = vld [vmem:[%s6652_s4 + $0x400] ss:$24 sps:$4 sm:$0xff]  }
  0x92   :  { %2043 = vmatprep.subr.bf16.mxu0 %v4588_v42  ;;  %v4669_v42 = vld [vmem:[%s6652_s4 + $0x3d4] ss:$24 sps:$4 sm:$0xff]  }
  0x93   :  { %2089 = vmatpush1.bf16.msra.mxu1 %v4583_v44  ;;  %v4664_v44 = vld [vmem:[%s6652_s4 + $0xd0] ss:$24 sps:$4 sm:$0xff]  }
  0x94   :  { %2090 = vmatprep.subr.bf16.mxu1 %v4591_v45  ;;  %v4962_v45 = vld [vmem:[%s6670_s0 + $0x4] ss:$24 sps:$4 sm:$0xff]  }
  0x95   :  { %2044 = vmatpush1.bf16.msra.mxu0 %v4586_v46  ;;  %v4672_v46 = vld [vmem:[%s6652_s4 + $0xa4] ss:$24 sps:$4 sm:$0xff]  }
  0x96   :  { %2045 = vmatprep.subr.bf16.mxu0 %v4594_v47  ;;  %v4667_v47 = vld [vmem:[%s6652_s4 + $0x3d0] ss:$24 sps:$4 sm:$0xff]  }
  0x97   :  { %2091 = vmatpush1.bf16.msra.mxu1 %v4589_v34  ;;  %v4963_v34 = vld [vmem:[%s6670_s0 + $0xc] ss:$24 sps:$4 sm:$0xff]  }
  0x98   :  { %2092 = vmatprep.subr.bf16.mxu1 %v4597_v48  ;;  %v4675_v48 = vld [vmem:[%s6652_s4 + $0x3a4] ss:$24 sps:$4 sm:$0xff]  }
  0x99   :  { %2046 = vmatpush1.bf16.msra.mxu0 %v4592_v49  ;;  %v4670_v49 = vld [vmem:[%s6652_s4 + $0xa0] ss:$24 sps:$4 sm:$0xff]  }
  0x9a   :  { %2047 = vmatprep.subr.bf16.mxu0 %v4600_v50  ;;  %v4678_v50 = vld [vmem:[%s6652_s4 + $0x74] ss:$24 sps:$4 sm:$0xff]  }
  0x9b   :  { %2093 = vmatpush1.bf16.msra.mxu1 %v4595_v52  ;;  %v4673_v52 = vld [vmem:[%s6652_s4 + $0x3a0] ss:$24 sps:$4 sm:$0xff]  }
  0x9c   :  { %2094 = vmatprep.subr.bf16.mxu1 %v4603_v53  ;;  %v4681_v53 = vld [vmem:[%s6652_s4 + $0x374] ss:$24 sps:$4 sm:$0xff]  }
  0x9d   :  { %2048 = vmatpush2.bf16.msra.mxu0 %v4598_v54  ;;  %v4676_v54 = vld [vmem:[%s6652_s4 + $0x70] ss:$24 sps:$4 sm:$0xff]  }
  0x9e   :  { %2049 = vmatprep.subr.bf16.mxu0 %v4606_v56  ;;  %v4679_v56 = vld [vmem:[%s6652_s4 + $0x370] ss:$24 sps:$4 sm:$0xff]  }
  0x9f   :  { %2095 = vmatpush1.bf16.msra.mxu1 %v4601_v55  ;;  %v4684_v55 = vld [vmem:[%s6652_s4 + $0x44] ss:$24 sps:$4 sm:$0xff]  }
  0xa0   :  { %2096 = vmatprep.subr.bf16.mxu1 %v4609_v57  ;;  %v4687_v57 = vld [vmem:[%s6652_s4 + $0x344] ss:$24 sps:$4 sm:$0xff]  }
  0xa1   :  { %2050 = vmatpush2.bf16.msra.mxu0 %v4604_v59  ;;  %v4690_v59 = vld [vmem:[%s6652_s4 + $0x14] ss:$24 sps:$4 sm:$0xff]  }
  0xa2   :  { %2051 = vmatprep.subr.bf16.mxu0 %v4612_v61  ;;  %v4693_v61 = vld [vmem:[%s6652_s4 + $0x314] ss:$24 sps:$4 sm:$0xff]  }
  0xa3   :  { %2097 = vmatpush1.bf16.msra.mxu1 %v4607_v60  ;;  %v4685_v60 = vld [vmem:[%s6652_s4 + $0x340] ss:$24 sps:$4 sm:$0xff]  }
  0xa4   :  { %2102 = vmatprep.subr.bf16.mxu1 %v1819_v63  ;;  %v4696_v63 = vld [vmem:[%s6652_s4 + $0x2e4] ss:$24 sps:$4 sm:$0xff]  }
  0xa5   :  { %2052 = vmatpush2.bf16.msra.mxu0 %v4610_v0  ;;  %v4691_v0 = vld [vmem:[%s6652_s4 + $0x310] ss:$24 sps:$4 sm:$0xff]  }
  0xa6   :  { %2053 = vmatprep.subr.bf16.mxu0 %v4618_v1  ;;  %v4699_v1 = vld [vmem:[%s6652_s4 + $0x5e4] ss:$24 sps:$4 sm:$0xff]  }
  0xa7   :  { %2103 = vmatpush2.bf16.msra.mxu1 %v1816_v2  ;;  %v4694_v2 = vld [vmem:[%s6652_s4 + $0x2e0] ss:$24 sps:$4 sm:$0xff]  }
  0xa8   :  { %2104 = vmatprep.subr.bf16.mxu1 %v4621_v4  ;;  %v4702_v4 = vld [vmem:[%s6652_s4 + $0x2b4] ss:$24 sps:$4 sm:$0xff]  }
  0xa9   :  { %2054 = vmatpush2.bf16.msra.mxu0 %v4616_v5  ;;  %v4697_v5 = vld [vmem:[%s6652_s4 + $0x5e0] ss:$24 sps:$4 sm:$0xff]  }
  0xaa   :  { %2055 = vmatprep.subr.bf16.mxu0 %v4624_v7  ;;  %v4705_v7 = vld [vmem:[%s6652_s4 + $0x5b4] ss:$24 sps:$4 sm:$0xff]  }
  0xab   :  { %2105 = vmatpush2.bf16.msra.mxu1 %v4619_v8  ;;  %v4700_v8 = vld [vmem:[%s6652_s4 + $0x2b0] ss:$24 sps:$4 sm:$0xff]  }
  0xac   :  { %2106 = vmatprep.subr.bf16.mxu1 %v4627_v9  ;;  %v4708_v9 = vld [vmem:[%s6652_s4 + $0x284] ss:$24 sps:$4 sm:$0xff]  }
  0xad   :  { %2056 = vmatpush2.bf16.msra.mxu0 %v4622_v10  ;;  %v4703_v10 = vld [vmem:[%s6652_s4 + $0x5b0] ss:$24 sps:$4 sm:$0xff]  }
  0xae   :  { %2057 = vmatprep.subr.bf16.mxu0 %v4630_v11  ;;  %v4711_v11 = vld [vmem:[%s6652_s4 + $0x584] ss:$24 sps:$4 sm:$0xff]  }
  0xaf   :  { %2107 = vmatpush2.bf16.msra.mxu1 %v4625_v12  ;;  %v4706_v12 = vld [vmem:[%s6652_s4 + $0x280] ss:$24 sps:$4 sm:$0xff]  }
  0xb0   :  { %2108 = vmatprep.subr.bf16.mxu1 %v4633_v14  ;;  %v4714_v14 = vld [vmem:[%s6652_s4 + $0x254] ss:$24 sps:$4 sm:$0xff]  }
  0xb1   :  { %2058 = vmatpush2.bf16.msra.mxu0 %v4628_v15  ;;  %v4709_v15 = vld [vmem:[%s6652_s4 + $0x580] ss:$24 sps:$4 sm:$0xff]  }
  0xb2   :  { %2059 = vmatprep.subr.bf16.mxu0 %v4636_v17  ;;  %v4712_v17 = vld [vmem:[%s6652_s4 + $0x250] ss:$24 sps:$4 sm:$0xff]  }
  0xb3   :  { %2109 = vmatpush2.bf16.msra.mxu1 %v4631_v18  ;;  %v4717_v18 = vld [vmem:[%s6652_s4 + $0x554] ss:$24 sps:$4 sm:$0xff]  }
  0xb4   :  { %2110 = vmatprep.subr.bf16.mxu1 %v4639_v21  ;;  %v4715_v21 = vld [vmem:[%s6652_s4 + $0x550] ss:$24 sps:$4 sm:$0xff]  }
  0xb5   :  { %2060 = vmatpush2.bf16.msra.mxu0 %v4634_v22  ;;  %v4720_v22 = vld [vmem:[%s6652_s4 + $0x224] ss:$24 sps:$4 sm:$0xff]  }
  0xb6   :  { %2061 = vmatprep.subr.bf16.mxu0 %v4642_v23  ;;  %v4723_v23 = vld [vmem:[%s6652_s4 + $0x524] ss:$24 sps:$4 sm:$0xff]  }
  0xb7   :  { %2111 = vmatpush2.bf16.msra.mxu1 %v4637_v24  ;;  %v4718_v24 = vld [vmem:[%s6652_s4 + $0x220] ss:$24 sps:$4 sm:$0xff]  }
  0xb8   :  { %2112 = vmatprep.subr.bf16.mxu1 %v4645_v28  ;;  %v4726_v28 = vld [vmem:[%s6652_s4 + $0x1f4] ss:$24 sps:$4 sm:$0xff]  }
  0xb9   :  { %2062 = vmatpush2.bf16.msra.mxu0 %v4640_v29  ;;  %v4721_v29 = vld [vmem:[%s6652_s4 + $0x520] ss:$24 sps:$4 sm:$0xff]  }
  0xba   :  { %2133 = vmatprep.subr.bf16.mxu0 %v4648_v30  ;;  %v4729_v30 = vld [vmem:[%s6652_s4 + $0x4f4] ss:$24 sps:$4 sm:$0xff]  }
  0xbb   :  { %2113 = vmatpush2.bf16.msra.mxu1 %v4643_v31  ;;  %v4724_v31 = vld [vmem:[%s6652_s4 + $0x1f0] ss:$24 sps:$4 sm:$0xff]  }
  0xbc   :  { %2064 = vmatmul.mubr.bf16.vlgmr.msra.gmra.mxu0 %v5306_v6  ;;  %2184 = vmatprep.subr.bf16.mxu1 %v4651_v32  ;;  %v4655_v6 = vld [vmem:[%s6652_s4 + $0x430] ss:$24 sps:$4 sm:$0xff]   ;;  %v4732_v32 = vld [vmem:[%s6652_s4 + $0x1c4] ss:$24 sps:$4 sm:$0xff]  }
  0xbd   :  { %2134 = vmatpush1.bf16.msra.mxu0 %v4646_v33  ;;  %2073 = vmatprep.mubr.bf16.mxu0 %v5367_v26  ;;  %v4727_v33 = vld [vmem:[%s6652_s4 + $0x4f0] ss:$24 sps:$4 sm:$0xff]  }
  0xbe   :  { %2115 = vmatmul.mubr.bf16.vlgmr.msra.gmra.mxu1 %v5510_v13  ;;  %2135 = vmatprep.subr.bf16.mxu0 %v4654_v35  ;;  %v4658_v13 = vld [vmem:[%s6652_s4 + $0x100] ss:$24 sps:$4 sm:$0xff]   ;;  %v4735_v35 = vld [vmem:[%s6652_s4 + $0x4c4] ss:$24 sps:$4 sm:$0xff]  }
  0xbf   :  { %2185 = vmatpush1.bf16.msra.mxu1 %v4649_v36  ;;  %4144 = vmatprep.mubr.msk.bf16.mxu1 %vm1798_vm1, %v5518_v16  ;;  %v4730_v36 = vld [vmem:[%s6652_s4 + $0x1c0] ss:$24 sps:$4 sm:$0xff]  }
  0xc0   :  { %2186 = vmatprep.subr.bf16.mxu1 %v4657_v38  ;;  %v4738_v38 = vld [vmem:[%s6652_s4 + $0x194] ss:$24 sps:$4 sm:$0xff]  }
  0xc1   :  { %2136 = vmatpush1.bf16.msra.mxu0 %v4652_v51  ;;  %v4733_v51 = vld [vmem:[%s6652_s4 + $0x4c0] ss:$24 sps:$4 sm:$0xff]  }
  0xc2   :  { %2137 = vmatprep.subr.bf16.mxu0 %v4660_v3  ;;  %v4741_v3 = vld [vmem:[%s6652_s4 + $0x494] ss:$24 sps:$4 sm:$0xff]  }
  0xc3   :  { %2187 = vmatpush1.bf16.msra.mxu1 %v4655_v6  ;;  %v4736_v6 = vld [vmem:[%s6652_s4 + $0x190] ss:$24 sps:$4 sm:$0xff]  }
  0xc4   :  { %2188 = vmatprep.subr.bf16.mxu1 %v4663_v39  ;;  %2074 = vmatmul.mubr.bf16.gmra.mxu0 %v5369_v27  ;;  %v4744_v39 = vld [vmem:[%s6652_s4 + $0x764] ss:$24 sps:$4 sm:$0xff]  }
  0xc5   :  { %2138 = vmatpush1.bf16.msra.mxu0 %v4658_v13  ;;  %2165 = vmatprep.mubr.bf16.mxu0 %v4962_v45  ;;  %v4739_v13 = vld [vmem:[%s6652_s4 + $0x490] ss:$24 sps:$4 sm:$0xff]  }
  0xc6   :  { %2139 = vmatprep.subr.bf16.mxu0 %v4666_v40  ;;  %2125 = vmatmul.mubr.bf16.gmra.mxu1 %v5541_v25  ;;  %v4759_v40 = vld [vmem:[%s6654_s6 + $0x74] ss:$8 sps:$4 sm:$0xff]   ;;  %v4745_v45 = vld [vmem:[%s6652_s4 + $0x730] ss:$24 sps:$4 sm:$0xff]  }
  0xc7   :  { %2189 = vmatpush1.bf16.msra.mxu1 %v4661_v41  ;;  %2216 = vmatprep.mubr.bf16.mxu1 %v4963_v34  ;;  %v4742_v41 = vld [vmem:[%s6652_s4 + $0x760] ss:$24 sps:$4 sm:$0xff]   ;;  %v4765_v34 = vld [vmem:[%s6654_s6 + $0x64] ss:$8 sps:$4 sm:$0xff]  }
  0xc8   :  { %2190 = vmatprep.subr.bf16.mxu1 %v4669_v42  ;;  %v4747_v42 = vld [vmem:[%s6652_s4 + $0x734] ss:$24 sps:$4 sm:$0xff]  }
  0xc9   :  { %2140 = vmatpush1.bf16.msra.mxu0 %v4664_v44  ;;  %v4757_v44 = vld [vmem:[%s6654_s6 + $0x70] ss:$8 sps:$4 sm:$0xff]  }
  0xca   :  { %2141 = vmatprep.subr.bf16.mxu0 %v4672_v46  ;;  %v4964_v46 = vld [vmem:[%s6670_s0] ss:$24 sps:$4 sm:$0xff]  }
  0xcb   :  { %2191 = vmatpush1.bf16.msra.mxu1 %v4667_v47  ;;  %v4750_v47 = vld [vmem:[%s6652_s4 + $0x704] ss:$24 sps:$4 sm:$0xff]  }
  0xcc   :  { %2192 = vmatprep.subr.bf16.mxu1 %v4675_v48  ;;  %v4763_v48 = vld [vmem:[%s6654_s6 + $0x60] ss:$8 sps:$4 sm:$0xff]  }
  0xcd   :  { %2142 = vmatpush1.bf16.msra.mxu0 %v4670_v49  ;;  %v4965_v49 = vld [vmem:[%s6670_s0 + $0x8] ss:$24 sps:$4 sm:$0xff]  }
  0xce   :  { %2143 = vmatprep.subr.bf16.mxu0 %v4678_v50  ;;  %v4771_v50 = vld [vmem:[%s6654_s6 + $0x54] ss:$8 sps:$4 sm:$0xff]  }
  0xcf   :  { %2193 = vmatpush1.bf16.msra.mxu1 %v4673_v52  ;;  %v4748_v52 = vld [vmem:[%s6652_s4 + $0x700] ss:$24 sps:$4 sm:$0xff]  }
  0xd0   :  { %2194 = vmatprep.subr.bf16.mxu1 %v4681_v53  ;;  %v4751_v53 = vld [vmem:[%s6652_s4 + $0x6d0] ss:$24 sps:$4 sm:$0xff]  }
  0xd1   :  { %2144 = vmatpush1.bf16.msra.mxu0 %v4676_v54 }
  0xd2   :  { %2145 = vmatprep.subr.bf16.mxu0 %v4684_v55  ;;  %v4777_v55 = vld [vmem:[%s6654_s6 + $0x44] ss:$8 sps:$4 sm:$0xff]  }
  0xd3   :  { %2195 = vmatpush1.bf16.msra.mxu1 %v4679_v56  ;;  %v4756_v56 = vld [vmem:[%s6652_s4 + $0x6a4] ss:$24 sps:$4 sm:$0xff]  }
  0xd4   :  { %2196 = vmatprep.subr.bf16.mxu1 %v4687_v57  ;;  %v4775_v57 = vld [vmem:[%s6654_s6 + $0x40] ss:$8 sps:$4 sm:$0xff]  }
  0xd5   :  { %2146 = vmatpush1.bf16.msra.mxu0 %v4682_v58  ;;  %v4966_v58 = vld [vmem:[%s6670_s0 + $0x14] ss:$24 sps:$4 sm:$0xff]  }
  0xd6   :  { %2147 = vmatprep.subr.bf16.mxu0 %v4690_v59 }
  0xd7   :  { %2197 = vmatpush1.bf16.msra.mxu1 %v4685_v60 }
  0xd8   :  { %2198 = vmatprep.subr.bf16.mxu1 %v4693_v61  ;;  %v4783_v61 = vld [vmem:[%s6654_s6 + $0x34] ss:$8 sps:$4 sm:$0xff]  }
  0xd9   :  { %2148 = vmatpush1.bf16.msra.mxu0 %v4688_v62 }
  0xda   :  { %2149 = vmatprep.subr.bf16.mxu0 %v4696_v63  ;;  %v4762_v63 = vld [vmem:[%s6652_s4 + $0x674] ss:$24 sps:$4 sm:$0xff]  }
  0xdb   :  { %2199 = vmatpush1.bf16.msra.mxu1 %v4691_v0 }
  0xdc   :  { %2200 = vmatprep.subr.bf16.mxu1 %v4699_v1  ;;  %v4789_v1 = vld [vmem:[%s6654_s6 + $0x24] ss:$8 sps:$4 sm:$0xff]  }
  0xdd   :  { %2150 = vmatpush2.bf16.msra.mxu0 %v4694_v2 }
  0xde   :  { %2151 = vmatprep.subr.bf16.mxu0 %v4702_v4 }
  0xdf   :  { %2201 = vmatpush2.bf16.msra.mxu1 %v4697_v5 }
  0xe0   :  { %2202 = vmatprep.subr.bf16.mxu1 %v4705_v7 }
  0xe1   :  { %2152 = vmatpush2.bf16.msra.mxu0 %v4700_v8 }
  0xe2   :  { %2153 = vmatprep.subr.bf16.mxu0 %v4708_v9 }
  0xe3   :  { %2203 = vmatpush2.bf16.msra.mxu1 %v4703_v10 }
  0xe4   :  { %2204 = vmatprep.subr.bf16.mxu1 %v4711_v11 }
  0xe5   :  { %2154 = vmatpush2.bf16.msra.mxu0 %v4706_v12 }
  0xe6   :  { %2155 = vmatprep.subr.bf16.mxu0 %v4714_v14 }
  0xe7   :  { %2205 = vmatpush2.bf16.msra.mxu1 %v4709_v15 }
  0xe8   :  { %2206 = vmatprep.subr.bf16.mxu1 %v4717_v18 }
  0xe9   :  { %2156 = vmatpush2.bf16.msra.mxu0 %v4712_v17 }
  0xea   :  { %2157 = vmatprep.subr.bf16.mxu0 %v4720_v22 }
  0xeb   :  { %2207 = vmatpush2.bf16.msra.mxu1 %v4715_v21 }
  0xec   :  { %2208 = vmatprep.subr.bf16.mxu1 %v4723_v23 }
  0xed   :  { %2158 = vmatpush2.bf16.msra.mxu0 %v4718_v24 }
  0xee   :  { %2159 = vmatprep.subr.bf16.mxu0 %v4726_v28 }
  0xef   :  { %2209 = vmatpush2.bf16.msra.mxu1 %v4721_v29 }
  0xf0   :  { %2210 = vmatprep.subr.bf16.mxu1 %v4729_v30 }
  0xf1   :  { %2160 = vmatpush2.bf16.msra.mxu0 %v4724_v31 }
  0xf2   :  { %2161 = vmatprep.subr.bf16.mxu0 %v4732_v32 }
  0xf3   :  { %2211 = vmatpush2.bf16.msra.mxu1 %v4727_v33 }
  0xf4   :  { %2212 = vmatprep.subr.bf16.mxu1 %v4735_v35 }
  0xf5   :  { %2162 = vmatpush2.bf16.msra.mxu0 %v4730_v36 }
  0xf6   :  { %2163 = vmatprep.subr.bf16.mxu0 %v4738_v38 }
  0xf7   :  { %2213 = vmatpush2.bf16.msra.mxu1 %v4733_v51 }
  0xf8   :  { %2214 = vmatprep.subr.bf16.mxu1 %v4741_v3 }
  0xf9   :  { %2164 = vmatpush2.bf16.msra.mxu0 %v4736_v6 }
  0xfa   :  { %2235 = vmatprep.subr.bf16.mxu0 %v4744_v39 }
  0xfb   :  { %2215 = vmatpush2.bf16.msra.mxu1 %v4739_v13 }
  0xfc   :  { %2166 = vmatmul.mubr.bf16.vlgmr.msra.gmra.mxu0 %v4964_v46  ;;  %2863 = vmatprep.subr.bf16.mxu1 %v4759_v40 }
  0xfd   :  { %2236 = vmatpush1.bf16.msra.mxu0 %v4742_v41  ;;  %2175 = vmatprep.mubr.bf16.mxu0 %v5346_v19  ;;  %v4753_v19 = vld [vmem:[%s6652_s4 + $0x6d4] ss:$24 sps:$4 sm:$0xff]  }
  0xfe   :  { %2217 = vmatmul.mubr.bf16.vlgmr.msra.gmra.mxu1 %v4965_v49  ;;  %2237 = vmatprep.subr.bf16.mxu0 %v4747_v42 }
  0xff   :  { %2864 = vmatpush1.bf16.msra.mxu1 %v4757_v44  ;;  %2226 = vmatprep.mubr.bf16.mxu1 %v5367_v26  ;;  %v4769_v26 = vld [vmem:[%s6654_s6 + $0x50] ss:$8 sps:$4 sm:$0xff]  }
 0x100   :  { %2865 = vmatprep.subr.bf16.mxu1 %v4765_v34 }
 0x101   :  { %2238 = vmatpush1.bf16.msra.mxu0 %v4745_v45 }
 0x102   :  { %2239 = vmatprep.subr.bf16.mxu0 %v4750_v47 }
 0x103   :  { %2866 = vmatpush1.bf16.msra.mxu1 %v4763_v48 }
 0x104   :  { %v5972_v54 = vpop.f32.mrf.mxu0  ;;  %2867 = vmatprep.subr.bf16.mxu1 %v4771_v50  ;;  %2176 = vmatmul.mubr.bf16.gmra.mxu0 %v5348_v20  ;;  %v4754_v20 = vld [vmem:[%s6652_s4 + $0x6a0] ss:$24 sps:$4 sm:$0xff]  }
 0x105   :  { %2240 = vmatpush1.bf16.msra.mxu0 %v4748_v52  ;;  %4145 = vmatprep.mubr.msk.bf16.mxu0 %vm1798_vm1, %v4966_v58  ;;  %v5990_v60 = vpop.f32.mrf.mxu1 }
 0x106   :  { %v5988_v59 = vpop.f32.mrf.mxu0  ;;  %2241 = vmatprep.subr.bf16.mxu0 %v4753_v19  ;;  %2227 = vmatmul.mubr.bf16.gmra.mxu1 %v5369_v27  ;;  %v4781_v27 = vld [vmem:[%s6654_s6 + $0x30] ss:$8 sps:$4 sm:$0xff]  }
 0x107   :  { %2868 = vmatpush1.bf16.msra.mxu1 %v4769_v26  ;;  %v6007_v0 = vpop.f32.mrf.mxu1 }
 0x108   :  { %2869 = vmatprep.subr.bf16.mxu1 %v4777_v55  ;;  %v5999_v62 = vpop.f32.mrf.mxu0 }
 0x109   :  { %2242 = vmatpush1.bf16.msra.mxu0 %v4751_v53 }
 0x10a   :  { %2243 = vmatprep.subr.bf16.mxu0 %v4756_v56 }
 0x10b   :  { %2870 = vmatpush1.bf16.msra.mxu1 %v4775_v57 }
 0x10c   :  { %2871 = vmatprep.subr.bf16.mxu1 %v4783_v61 }
 0x10d   :  { %22 = vsyncpa [#allocation3], 0  ;;  %v6012_v2 = vpop.f32.mrf.mxu0  ;;  %2244 = vmatpush1.bf16.msra.mxu0 %v4754_v20  ;;  %v4760_v4 = vld [vmem:[%s6652_s4 + $0x670] ss:$24 sps:$4 sm:$0xff]   ;;  %v6017_v5 = vpop.f32.mrf.mxu1  ;;  %v4768_v7 = vld [vmem:[%s6652_s4 + $0x644] ss:$24 sps:$4 sm:$0xff]   ;;  %v345_v49 = vlaneseq }
 0x10e   :  { %2245 = vmatprep.subr.bf16.mxu0 %v4762_v63  ;;  %v4787_v8 = vld [vmem:[%s6654_s6 + $0x20] ss:$8 sps:$4 sm:$0xff]   ;;  %v4795_v10 = vld [vmem:[%s6654_s6 + $0x14] ss:$8 sps:$4 sm:$0xff]   ;;  %v4793_v18 = vld [vmem:[%s6654_s6 + $0x10] ss:$8 sps:$4 sm:$0xff]  }
 0x10f   :  { %2872 = vmatpush1.bf16.msra.mxu1 %v4781_v27  ;;  %v6025_v9 = vpop.f32.mrf.mxu0  ;;  %v4766_v11 = vld [vmem:[%s6652_s4 + $0x640] ss:$24 sps:$4 sm:$0xff]   ;;  %v6035_v14 = vpop.f32.mrf.mxu1  ;;  %v4774_v15 = vld [vmem:[%s6652_s4 + $0x614] ss:$24 sps:$4 sm:$0xff]   ;;  %v4772_v24 = vld [vmem:[%s6652_s4 + $0x610] ss:$24 sps:$4 sm:$0xff]  }
 0x110   :  { %2873 = vmatprep.subr.bf16.mxu1 %v4789_v1  ;;  %v4780_v17 = vld [vmem:[%s6652_s4 + $0x884] ss:$24 sps:$4 sm:$0x1f]   ;;  %v4778_v28 = vld [vmem:[%s6652_s4 + $0x880] ss:$24 sps:$4 sm:$0x1f]  }
 0x111   :  { %2246 = vmatpush1.bf16.msra.mxu0 %v4760_v4  ;;  %v6033_v12 = vpop.f32.mrf.mxu0  ;;  %v4801_v22 = vld [vmem:[%s6654_s6 + $0x4] ss:$8 sps:$4 sm:$0xff]   ;;  %v6049_v23 = vpop.f32.mrf.mxu1  ;;  %v1825_v30 = vand.u32 %v4780_v17, %v5419_v43  ;;  %v4799_v32 = vld [vmem:[%s6654_s6] ss:$8 sps:$4 sm:$0xff]   ;;  %v4807_v33 = vld [vmem:[%s6654_s6 + $0xf4] ss:$8 sps:$4 sm:$0xff]   ;;  %v1822_v36 = vand.u32 %v4778_v28, %v5419_v43 }
 0x112   :  { %2247 = vmatprep.subr.bf16.mxu0 %v4768_v7  ;;  %v4786_v38 = vld [vmem:[%s6652_s4 + $0x854] ss:$24 sps:$4 sm:$0xff]   ;;  %v4805_v3 = vld [vmem:[%s6654_s6 + $0xf0] ss:$8 sps:$4 sm:$0xff]   ;;  %v4792_v39 = vld [vmem:[%s6652_s4 + $0x824] ss:$24 sps:$4 sm:$0xff]  }
 0x113   :  { %2874 = vmatpush1.bf16.msra.mxu1 %v4787_v8  ;;  %v1875_v21 = vpop.f32.mrf.mxu0  ;;  %v6058_v31 = vpop.f32.mrf.mxu1  ;;  %v4813_v6 = vld [vmem:[%s6654_s6 + $0xe4] ss:$8 sps:$4 sm:$0xff]   ;;  %v4784_v43 = vld [vmem:[%s6652_s4 + $0x850] ss:$24 sps:$4 sm:$0xff]   ;;  %v4816_v40 = vld [vmem:[%s6654_s6 + $0xd4] ss:$8 sps:$4 sm:$0xff]  }
 0x114   :  { %2875 = vmatprep.subr.bf16.mxu1 %v4795_v10  ;;  %v4811_v13 = vld [vmem:[%s6654_s6 + $0xe0] ss:$8 sps:$4 sm:$0xff]   ;;  %v4798_v42 = vld [vmem:[%s6652_s4 + $0x7f4] ss:$24 sps:$4 sm:$0xff]   ;;  %v4814_v44 = vld [vmem:[%s6654_s6 + $0xd0] ss:$8 sps:$4 sm:$0xff]  }
 0x115   :  { %2248 = vmatpush1.bf16.msra.mxu0 %v4766_v11  ;;  %v1876_v29 = vpop.f32.mrf.mxu0  ;;  %v1926_v35 = vpop.f32.mrf.mxu1  ;;  %v4790_v41 = vld [vmem:[%s6652_s4 + $0x820] ss:$24 sps:$4 sm:$0xff]   ;;  %v4819_v45 = vld [vmem:[%s6654_s6 + $0xc4] ss:$8 sps:$4 sm:$0xff]   ;;  %v4796_v46 = vld [vmem:[%s6652_s4 + $0x7f0] ss:$24 sps:$4 sm:$0xff]  }
 0x116   :  { %2249 = vmatprep.subr.bf16.mxu0 %v4774_v15  ;;  %v4804_v47 = vld [vmem:[%s6652_s4 + $0x7c4] ss:$24 sps:$4 sm:$0xff]   ;;  %v4817_v34 = vld [vmem:[%s6654_s6 + $0xc0] ss:$8 sps:$4 sm:$0xff]   ;;  %v4810_v52 = vld [vmem:[%s6652_s4 + $0x794] ss:$24 sps:$4 sm:$0xff]  }
 0x117   :  { %2876 = vmatpush1.bf16.msra.mxu1 %v4793_v18  ;;  %v1927_v51 = vpop.f32.mrf.mxu1  ;;  %v4822_v48 = vld [vmem:[%s6654_s6 + $0xb4] ss:$8 sps:$4 sm:$0xff]   ;;  %v4802_v50 = vld [vmem:[%s6652_s4 + $0x7c0] ss:$24 sps:$4 sm:$0xff]   ;;  %v4825_v53 = vld [vmem:[%s6654_s6 + $0xa4] ss:$8 sps:$4 sm:$0xff]  }
 0x118   :  { %2877 = vmatprep.subr.bf16.mxu1 %v4801_v22  ;;  %v4820_v19 = vld [vmem:[%s6654_s6 + $0xb0] ss:$8 sps:$4 sm:$0xff]   ;;  %v6124_v26 = vshrl.u32 %v345_v49, 7  ;;  %v4834_v56 = vld [vmem:[%s6654_s6 + $0x174] ss:$8 sps:$4 sm:$0xff]   ;;  %s6671_s26 = sld [smem:[#allocation6_spill]] }
 0x119   :  { %2250 = vmatpush1.bf16.msra.mxu0 %v4772_v24  ;;  %v4808_v55 = vld [vmem:[%s6652_s4 + $0x790] ss:$24 sps:$4 sm:$0xff]   ;;  %v4828_v58 = vld [vmem:[%s6654_s6 + $0x94] ss:$8 sps:$4 sm:$0xff]   ;;  %v6147_v63 = vld [vmem:[%s6653_s5] sm:$0x3f] }
 0x11a   :  { %2255 = vmatprep.subr.bf16.mxu0 %v1825_v30  ;;  %v4823_v57 = vld [vmem:[%s6654_s6 + $0xa0] ss:$8 sps:$4 sm:$0xff]   ;;  %v6139_v20 = vsub.s32 1, %v6124_v26  ;;  %v4832_v61 = vld [vmem:[%s6654_s6 + $0x170] ss:$8 sps:$4 sm:$0xff]   ;;  %v6150_v27 = vsub.s32 0, %v6124_v26 }
 0x11b   :  { %2878 = vmatpush1.bf16.msra.mxu1 %v4799_v32  ;;  %v4837_v1 = vld [vmem:[%s6654_s6 + $0x164] ss:$8 sps:$4 sm:$0xff]   ;;  %v4826_v4 = vld [vmem:[%s6654_s6 + $0x90] ss:$8 sps:$4 sm:$0xff]   ;;  %v4835_v11 = vld [vmem:[%s6654_s6 + $0x160] ss:$8 sps:$4 sm:$0xff]  }
 0x11c   :  { %2879 = vmatprep.subr.bf16.mxu1 %v4807_v33  ;;  %v4967_v7 = vld [vmem:[%s6670_s0 + $0x10] ss:$24 sps:$4 sm:$0xff]   ;;  %v4831_v8 = vld [vmem:[%s6654_s6 + $0x84] ss:$8 sps:$4 sm:$0xff]   ;;  %v352_v10 = vrot.slane %v6147_v63, %v6139_v20  ;;  %v348_v15 = vrot.slane %v6147_v63, %v6150_v27  ;;  %v4840_v17 = vld [vmem:[%s6654_s6 + $0x154] ss:$8 sps:$4 sm:$0xff]  }
 0x11d   :  { %2256 = vmatpush2.bf16.msra.mxu0 %v1822_v36  ;;  %v4829_v18 = vld [vmem:[%s6654_s6 + $0x80] ss:$8 sps:$4 sm:$0xff]   ;;  %v4838_v21 = vld [vmem:[%s6654_s6 + $0x150] ss:$8 sps:$4 sm:$0xff]   ;;  %v4843_v24 = vld [vmem:[%s6654_s6 + $0x144] ss:$8 sps:$4 sm:$0xff]  }
 0x11e   :  { %2257 = vmatprep.subr.bf16.mxu0 %v4786_v38  ;;  %v1862_v22 = vadd.f32 %v5972_v54, %v348_v15  ;;  %v1866_v28 = vadd.f32 %v5999_v62, %v348_v15  ;;  %v1868_v30 = vadd.f32 %v6012_v2, %v352_v10  ;;  %v4841_v54 = vld [vmem:[%s6654_s6 + $0x140] ss:$8 sps:$4 sm:$0xff]   ;;  %v4846_v62 = vld [vmem:[%s6654_s6 + $0x134] ss:$8 sps:$4 sm:$0xff]   ;;  %v1874_v51 = vadd.f32 %v6033_v12, %v352_v10  ;;  %s4994_s24 = smov [#allocation2]  }
 0x11f   :  { %2880 = vmatpush2.bf16.msra.mxu1 %v4805_v3  ;;  %vm2850_vm3 = vcmask 64512   ;;  %vm3435_vm4 = vcmask 1040384   ;;  %vm3436_vm5 = vcmask 1041408   ;;  %vm3223_vm6 = vcmask 130048  }
 0x120   :  { %2881 = vmatprep.subr.bf16.mxu1 %v4813_v6  ;;  %v1913_v32 = vadd.f32 %v5990_v60, %v1862_v22  ;;  %v1917_v35 = vadd.f32 %v6017_v5, %v1866_v28  ;;  %v1919_v38 = vadd.f32 %v6035_v14, %v1868_v30  ;;  %v4844_v60 = vld [vmem:[%s6654_s6 + $0x130] ss:$8 sps:$4 sm:$0xff]   ;;  %v4849_v5 = vld [vmem:[%s6654_s6 + $0x124] ss:$8 sps:$4 sm:$0xff]   ;;  %v4853_v28 = vld [vmem:[%s6654_s6 + $0x100] ss:$8 sps:$4 sm:$0xff]  }
 0x121   :  { %2258 = vmatpush2.bf16.msra.mxu0 %v4784_v43  ;;  %v2310_v14 = vld [vmem:[%s6671_s26 + $0x30] sm:$0xff]  ;;  %vm4993_vm7 = vmmov 0   ;;  %vm3431_vm8 = vcmask 23552   ;;  %vm3631_vm9 = vcmask 261120   ;;  %vm3837_vm10 = vcmask 123904  }
 0x122   :  { %2259 = vmatprep.subr.bf16.mxu0 %v4792_v39  ;;  %v4858_v30 = vld [vmem:[%s6654_s6 + $0x1f4] ss:$8 sps:$4 sm:$0xff]  }
 0x123   :  { %2882 = vmatpush2.bf16.msra.mxu1 %v4811_v13 }
 0x124   :  { %2883 = vmatprep.subr.bf16.mxu1 %v4816_v40  ;;  %v2305_v40 = vld [vmem:[%s6671_s26 + $0x8] sm:$0xff] }
 0x125   :  { %2260 = vmatpush2.bf16.msra.mxu0 %v4790_v41  ;;  %v2311_v41 = vld [vmem:[%s6671_s26 + $0x38] sm:$0xff] }
 0x126   :  { %2261 = vmatprep.subr.bf16.mxu0 %v4798_v42 }
 0x127   :  { %2884 = vmatpush2.bf16.msra.mxu1 %v4814_v44  ;;  %v1925_v44 = vadd.f32 %v6058_v31, %v1874_v51  ;;  %v4852_v31 = vld [vmem:[%s6654_s6 + $0x114] ss:$8 sps:$4 sm:$0xff]   ;;  %v4859_v51 = vld [vmem:[%s6654_s6 + $0x1e0] ss:$8 sps:$4 sm:$0xff]  }
 0x128   :  { %2885 = vmatprep.subr.bf16.mxu1 %v4819_v45  ;;  %v2304_v45 = vld [vmem:[%s6671_s26] sm:$0xff] }
 0x129   :  { %2262 = vmatpush2.bf16.msra.mxu0 %v4796_v46 }
 0x12a   :  { %2263 = vmatprep.subr.bf16.mxu0 %v4804_v47  ;;  %v4882_v47 = vld [vmem:[%s6654_s6 + $0x274] ss:$8 sps:$4 sm:$0xff]  }
 0x12b   :  { %2886 = vmatpush2.bf16.msra.mxu1 %v4817_v34 }
 0x12c   :  { %2887 = vmatprep.subr.bf16.mxu1 %v4822_v48 }
 0x12d   :  { %2264 = vmatpush2.bf16.msra.mxu0 %v4802_v50 }
 0x12e   :  { %2265 = vmatprep.subr.bf16.mxu0 %v4810_v52 }
 0x12f   :  { %2888 = vmatpush2.bf16.msra.mxu1 %v4820_v19 }
 0x130   :  { %2889 = vmatprep.subr.bf16.mxu1 %v4825_v53 }
 0x131   :  { %2266 = vmatpush2.bf16.msra.mxu0 %v4808_v55 }
 0x132   :  { %2914 = vmatprep.subr.bf16.mxu0 %v4834_v56  ;;  %v2317_v56 = vld [vmem:[%s6671_s26 + $0x68] sm:$0x3] }
 0x133   :  { %2890 = vmatpush2.bf16.msra.mxu1 %v4823_v57 }
 0x134   :  { %2268 = vmatmul.mubr.bf16.vlgmr.msra.gmra.mxu0 %v4967_v7  ;;  %2891 = vmatprep.subr.bf16.mxu1 %v4828_v58  ;;  %v4880_v7 = vld [vmem:[%s6654_s6 + $0x270] ss:$8 sps:$4 sm:$0xff]  }
 0x135   :  { %4146 = vmatprep.mubr.msk.bf16.mxu0 %vm1798_vm1, %v5518_v16  ;;  %2915 = vmatpush1.bf16.msra.mxu0 %v4832_v61  ;;  %v1864_v16 = vadd.f32 %v5988_v59, %v352_v10 }
 0x136   :  { %2916 = vmatprep.subr.bf16.mxu0 %v4837_v1 }
 0x137   :  { %2892 = vmatpush2.bf16.msra.mxu1 %v4826_v4  ;;  %v1915_v59 = vadd.f32 %v6007_v0, %v1864_v16  ;;  %v1872_v0 = vadd.f32 %v6025_v9, %v348_v15  ;;  %v4850_v4 = vld [vmem:[%s6654_s6 + $0x110] ss:$8 sps:$4 sm:$0xff]   ;;  %v2316_v16 = vld [vmem:[%s6671_s26 + $0x60] sm:$0x3] }
 0x138   :  { %2893 = vmatprep.subr.bf16.mxu1 %v4831_v8 }
 0x139   :  { %2917 = vmatpush1.bf16.msra.mxu0 %v4835_v11  ;;  %v1923_v12 = vadd.f32 %v6049_v23, %v1872_v0  ;;  %v4847_v23 = vld [vmem:[%s6654_s6 + $0x120] ss:$8 sps:$4 sm:$0xff]   ;;  %v4855_v11 = vld [vmem:[%s6654_s6 + $0x104] ss:$8 sps:$4 sm:$0xff]  }
 0x13a   :  { %2918 = vmatprep.subr.bf16.mxu0 %v4840_v17  ;;  %v4861_v0 = vld [vmem:[%s6654_s6 + $0x1e4] ss:$8 sps:$4 sm:$0xff]  }
 0x13b   :  { %2894 = vmatpush2.bf16.msra.mxu1 %v4829_v18  ;;  %v4885_v18 = vld [vmem:[%s6654_s6 + $0x264] ss:$8 sps:$4 sm:$0xff]  }
 0x13c   :  { %v1963_v29 = vpop.f32.mrf.mxu0  ;;  %2278 = vmatmul.mubr.bf16.gmra.mxu0 %v5541_v25  ;;  %2965 = vmatprep.subr.bf16.mxu1 %v4882_v47  ;;  %v359_v47 = vsub.s32 3, %v6124_v26 }
 0x13d   :  { %2919 = vmatpush1.bf16.msra.mxu0 %v4838_v21  ;;  %v1964_v36 = vadd.f32 %v1963_v29, %v1913_v32  ;;  %v4883_v29 = vld [vmem:[%s6654_s6 + $0x260] ss:$8 sps:$4 sm:$0xff]   ;;  %v4888_v32 = vld [vmem:[%s6654_s6 + $0x254] ss:$8 sps:$4 sm:$0xff]  }
 0x13e   :  { %v1965_v33 = vpop.f32.mrf.mxu0  ;;  %2920 = vmatprep.subr.bf16.mxu0 %v4843_v24 }
 0x13f   :  { %v1966_v25 = vadd.f32 %v1965_v33, %v1915_v59  ;;  %v2286_v13 = vmax.f32 %v1964_v36, 0.0 }
 0x140   :  { %v1967_v2 = vpop.f32.mrf.mxu0 }
 0x141   :  { %v1968_v3 = vadd.f32 %v1967_v2, %v1917_v35  ;;  %2921 = vmatpush1.bf16.msra.mxu0 %v4841_v54  ;;  %v2287_v43 = vmax.f32 %v1966_v25, 0.0  ;;  %v2322_v55 = vmul.f32 %v2304_v45, %v2286_v13  ;;  %v4886_v35 = vld [vmem:[%s6654_s6 + $0x250] ss:$8 sps:$4 sm:$0xff]   ;;  %v4891_v2 = vld [vmem:[%s6654_s6 + $0x244] ss:$8 sps:$4 sm:$0xff]  }
 0x142   :  { %v1969_v6 = vpop.f32.mrf.mxu0  ;;  %2922 = vmatprep.subr.bf16.mxu0 %v4846_v62  ;;  %v4856_v62 = vld [vmem:[%s6654_s6 + $0x1f0] ss:$8 sps:$4 sm:$0xff]   ;;  %v4873_v13 = vld [vmem:[%s6654_s6 + $0x1a4] ss:$8 sps:$4 sm:$0xff]   ;;  %v4877_v45 = vld [vmem:[%s6654_s6 + $0x180] ss:$8 sps:$4 sm:$0xff]  }
 0x143   :  { %v2292_v9 = vmax.f32 %v1968_v3, 0.0  ;;  %v1970_v39 = vadd.f32 %v1969_v6, %v1919_v38  ;;  %v2323_v52 = vmul.f32 %v2305_v40, %v2287_v43  ;;  %v4889_v3 = vld [vmem:[%s6654_s6 + $0x240] ss:$8 sps:$4 sm:$0xff]   ;;  %v4894_v6 = vld [vmem:[%s6654_s6 + $0x234] ss:$8 sps:$4 sm:$0xff]  }
 0x144   :  { %v1973_v42 = vpop.f32.mrf.mxu0  ;;  %v4892_v43 = vld [vmem:[%s6654_s6 + $0x230] ss:$8 sps:$4 sm:$0xff]   ;;  %v4871_v40 = vld [vmem:[%s6654_s6 + $0x1a0] ss:$8 sps:$4 sm:$0xff]  }
 0x145   :  { %v2293_v46 = vmax.f32 %v1970_v39, 0.0  ;;  %2923 = vmatpush1.bf16.msra.mxu0 %v4844_v60  ;;  %v2328_v34 = vmul.f32 %v2310_v14, %v2292_v9  ;;  %v1974_v48 = vadd.f32 %v1973_v42, %v1923_v12  ;;  %v4864_v60 = vld [vmem:[%s6654_s6 + $0x1d4] ss:$8 sps:$4 sm:$0xff]   ;;  %v4867_v9 = vld [vmem:[%s6654_s6 + $0x1c4] ss:$8 sps:$4 sm:$0xff]  }
 0x146   :  { %v1975_v49 = vpop.f32.mrf.mxu0  ;;  %2924 = vmatprep.subr.bf16.mxu0 %v4849_v5  ;;  %v6231_v50 = vpop.f32.mrf.mxu1  ;;  %v4862_v5 = vld [vmem:[%s6654_s6 + $0x1d0] ss:$8 sps:$4 sm:$0xff]   ;;  %v4865_v14 = vld [vmem:[%s6654_s6 + $0x1c0] ss:$8 sps:$4 sm:$0xff]   ;;  %v4870_v39 = vld [vmem:[%s6654_s6 + $0x1b4] ss:$8 sps:$4 sm:$0xff]  }
 0x147   :  { %v2329_v19 = vmul.f32 %v2311_v41, %v2293_v46  ;;  %v1976_v53 = vadd.f32 %v1975_v49, %v1925_v44  ;;  %v2340_v8 = vpack.c.bf16 %v2328_v34, %v2322_v55  ;;  %v2298_v10 = vmax.f32 %v1974_v48, 0.0  ;;  %v4868_v12 = vld [vmem:[%s6654_s6 + $0x1b0] ss:$8 sps:$4 sm:$0xff]   ;;  %v4876_v41 = vld [vmem:[%s6654_s6 + $0x194] ss:$8 sps:$4 sm:$0xff]  }
 0x148   :  { %v6236_v57 = vpop.f32.mrf.mxu1  ;;  %v1977_v58 = vpop.f32.mrf.mxu0  ;;  %v4874_v42 = vld [vmem:[%s6654_s6 + $0x190] ss:$8 sps:$4 sm:$0xff]   ;;  %v4879_v44 = vld [vmem:[%s6654_s6 + $0x184] ss:$8 sps:$4 sm:$0xff]   ;;  %v355_v46 = vsub.s32 2, %v6124_v26 }
 0x149   :  { %v2299_v61 = vmax.f32 %v1976_v53, 0.0  ;;  %v2341_v1 = vpack.c.bf16 %v2329_v19, %v2323_v52  ;;  %2925 = vmatpush1.bf16.msra.mxu0 %v4847_v23  ;;  %v2334_v59 = vmul.f32 %v2316_v16, %v2298_v10  ;;  %v4897_v23 = vld [vmem:[%s6654_s6 + $0x224] ss:$8 sps:$4 sm:$0xff]   ;;  %v4895_v34 = vld [vmem:[%s6654_s6 + $0x220] ss:$8 sps:$4 sm:$0xff]  }
 0x14a   :  { %2926 = vmatprep.subr.bf16.mxu0 %v4852_v31  ;;  %v6247_v15 = vpop.f32.mrf.mxu1  ;;  %v1978_v17 = vpop.f32.mrf.mxu0  ;;  %v356_v48 = vrot.slane %v6147_v63, %v355_v46  ;;  %v4900_v49 = vld [vmem:[%s6654_s6 + $0x214] ss:$8 sps:$4 sm:$0xff]   ;;  %v360_v31 = vrot.slane %v6147_v63, %v359_v47  ;;  %v4898_v52 = vld [vmem:[%s6654_s6 + $0x210] ss:$8 sps:$4 sm:$0xff]   ;;  %v4903_v53 = vld [vmem:[%s6654_s6 + $0x204] ss:$8 sps:$4 sm:$0xff]  }
 0x14b   :  { %v2335_v21 = vmul.f32 %v2317_v56, %v2299_v61  ;;  %2895 = vmatprep.mubr.bf16.mxu1 %v2341_v1  ;;  %v2346_v25 = vpack.c.bf16 %v2334_v59, %v2334_v59  ;;  %v4901_v56 = vld [vmem:[%s6654_s6 + $0x200] ss:$8 sps:$4 sm:$0xff]  }
 0x14c   :  { %2896 = vmatmul.mubr.bf16.vlgmr.msra.gmra.mxu1 %v2340_v8  ;;  %v6255_v22 = vpop.f32.mrf.mxu1  ;;  %v2015_v19 = vadd.f32 %v6231_v50, %v356_v48  ;;  %v2017_v55 = vadd.f32 %v6236_v57, %v360_v31  ;;  %v2432_v61 = vld [vmem:[%s6654_s6 + $0x280] sm:$0xff]  ;;  %v2019_v10 = vadd.f32 %v6247_v15, %v356_v48 }
 0x14d   :  { %v2347_v24 = vpack.c.bf16 %v2335_v21, %v2335_v21  ;;  %2927 = vmatpush1.bf16.msra.mxu0 %v4850_v4  ;;  %2966 = vmatpush1.bf16.msra.mxu1 %v4880_v7  ;;  %v4228_v7 = vcombine.high %v2432_v61, %v2432_v61  ;;  %v4227_v8 = vcombine.low %v2432_v61, %v2432_v61 }
 0x14e   :  { %2928 = vmatprep.subr.bf16.mxu0 %v4855_v11  ;;  %v6266_v54 = vpop.f32.mrf.mxu1  ;;  %2967 = vmatprep.subr.bf16.mxu1 %v4885_v18  ;;  %v2021_v16 = vadd.f32 %v6255_v22, %v360_v31  ;;  %v2312_v22 = vld [vmem:[%s6671_s26 + $0x40] sm:$0xff] }
 0x14f   :  { %2905 = vmatprep.mubr.bf16.mxu1 %v2347_v24  ;;  %v2858_v18 = vsel %vm1805_vm0, %v4227_v8, 0  ;;  %v2025_v21 = vadd.f32 %v6266_v54, %v356_v48 }
 0x150   :  { %v6271_v33 = vpop.f32.mrf.mxu1 }
 0x151   :  { %2929 = vmatpush1.bf16.msra.mxu0 %v4853_v28  ;;  %2968 = vmatpush1.bf16.msra.mxu1 %v4883_v29 }
 0x152   :  { %2930 = vmatprep.subr.bf16.mxu0 %v4858_v30  ;;  %v2028_v36 = vpop.f32.mrf.mxu1  ;;  %2969 = vmatprep.subr.bf16.mxu1 %v4888_v32  ;;  %v2027_v32 = vadd.f32 %v6271_v33, %v360_v31  ;;  %v2313_v33 = vld [vmem:[%s6671_s26 + $0x48] sm:$0xff] }
 0x154   :  { %2906 = vmatmul.mubr.bf16.gmra.mxu1 %v2346_v25  ;;  %v2029_v38 = vpop.f32.mrf.mxu1 }
 0x155   :  { %2931 = vmatpush2.bf16.msra.mxu0 %v4856_v62  ;;  %2970 = vmatpush1.bf16.msra.mxu1 %v4886_v35 }
 0x156   :  { %2932 = vmatprep.subr.bf16.mxu0 %v4861_v0  ;;  %2971 = vmatprep.subr.bf16.mxu1 %v4891_v2 }
 0x159   :  { %2933 = vmatpush2.bf16.msra.mxu0 %v4859_v51  ;;  %2972 = vmatpush1.bf16.msra.mxu1 %v4889_v3  ;;  %v2307_v51 = vld [vmem:[%s6671_s26 + $0x18] sm:$0xff] }
 0x15a   :  { %2934 = vmatprep.subr.bf16.mxu0 %v4864_v60  ;;  %2973 = vmatprep.subr.bf16.mxu1 %v4894_v6  ;;  %v2306_v6 = vld [vmem:[%s6671_s26 + $0x10] sm:$0xff] }
 0x15d   :  { %2935 = vmatpush2.bf16.msra.mxu0 %v4862_v5  ;;  %2974 = vmatpush1.bf16.msra.mxu1 %v4892_v43 }
 0x15e   :  { %2936 = vmatprep.subr.bf16.mxu0 %v4867_v9  ;;  %2975 = vmatprep.subr.bf16.mxu1 %v4897_v23 }
 0x161   :  { %2937 = vmatpush2.bf16.msra.mxu0 %v4865_v14  ;;  %2976 = vmatpush1.bf16.msra.mxu1 %v4895_v34  ;;  %v2318_v34 = vld [vmem:[%s6671_s26 + $0x70] sm:$0x3] }
 0x162   :  { %2938 = vmatprep.subr.bf16.mxu0 %v4870_v39  ;;  %2977 = vmatprep.subr.bf16.mxu1 %v4900_v49 }
 0x165   :  { %2939 = vmatpush2.bf16.msra.mxu0 %v4868_v12  ;;  %2978 = vmatpush1.bf16.msra.mxu1 %v4898_v52 }
 0x166   :  { %2940 = vmatprep.subr.bf16.mxu0 %v4873_v13  ;;  %2979 = vmatprep.subr.bf16.mxu1 %v4903_v53 }
 0x169   :  { %2941 = vmatpush2.bf16.msra.mxu0 %v4871_v40  ;;  %2980 = vmatpush1.bf16.msra.mxu1 %v4901_v56 }
 0x16a   :  { %2942 = vmatprep.subr.bf16.mxu0 %v4876_v41  ;;  %4229 = vmatprep.subr.msk.bf16.mxu1 %vm1805_vm0, %v4228_v7 }
 0x16d   :  { %2943 = vmatpush2.bf16.msra.mxu0 %v4874_v42  ;;  %2996 = vmatpush2.bf16.msra.mxu1 %v2858_v18 }
 0x16e   :  { %2944 = vmatprep.subr.bf16.mxu0 %v4879_v44 }
 0x171   :  { %2945 = vmatpush2.bf16.msra.mxu0 %v4877_v45  ;;  %v2319_v45 = vld [vmem:[%s6671_s26 + $0x78] sm:$0x3] }
 0x17c   :  { %v2065_v58 = vpop.f32.mrf.mxu0 }
 0x17d   :  { %v2066_v1 = vadd.f32 %v2065_v58, %v2015_v19 }
 0x17e   :  { %v2067_v4 = vpop.f32.mrf.mxu0  ;;  %v2116_v50 = vpop.f32.mrf.mxu1 }
 0x17f   :  { %v2068_v11 = vadd.f32 %v2067_v4, %v2017_v55  ;;  %v2117_v29 = vadd.f32 %v2116_v50, %v2066_v1 }
 0x180   :  { %v2069_v57 = vpop.f32.mrf.mxu0  ;;  %v2118_v17 = vpop.f32.mrf.mxu1 }
 0x181   :  { %v2070_v24 = vadd.f32 %v2069_v57, %v2019_v10  ;;  %v2119_v28 = vadd.f32 %v2118_v17, %v2068_v11  ;;  %v2288_v38 = vmax.f32 %v2117_v29, 0.0  ;;  %v4908_v29 = vld [vmem:[%s6656_s8 + $0xac] ss:$12 sps:$4 sm:$0xff]  }
 0x182   :  { %v2071_v59 = vpop.f32.mrf.mxu0  ;;  %v2120_v30 = vpop.f32.mrf.mxu1  ;;  %3230 = vmatprep.subr.bf16.mxu1 %v4908_v29 }
 0x183   :  { %v2072_v15 = vadd.f32 %v2071_v59, %v2021_v16  ;;  %v2121_v62 = vadd.f32 %v2120_v30, %v2070_v24  ;;  %v2289_v0 = vmax.f32 %v2119_v28, 0.0  ;;  %v2324_v42 = vmul.f32 %v2306_v6, %v2288_v38  ;;  %v4909_v30 = vld [vmem:[%s6656_s8 + $0xb0] ss:$12 sps:$4 sm:$0xff]  }
 0x184   :  { %v2122_v35 = vpop.f32.mrf.mxu1  ;;  %v2075_v25 = vpop.f32.mrf.mxu0  ;;  %v4991_v59 = vmov 0  }
 0x185   :  { %v2294_v36 = vmax.f32 %v2121_v62, 0.0  ;;  %v2123_v2 = vadd.f32 %v2122_v35, %v2072_v15  ;;  %v2076_v54 = vadd.f32 %v2075_v25, %v2025_v21  ;;  %v2325_v13 = vmul.f32 %v2307_v51, %v2289_v0  ;;  %3281 = vmatprep.subr.bf16.mxu0 %v4991_v59  ;;  %v4917_v15 = vld [vmem:[%s6656_s8 + $0x80] ss:$12 sps:$4 sm:$0xff]   ;;  %v4921_v62 = vld [vmem:[%s6656_s8 + $0x68] ss:$12 sps:$4 sm:$0xff]  }
 0x186   :  { %v2077_v3 = vpop.f32.mrf.mxu0  ;;  %v2126_v60 = vpop.f32.mrf.mxu1  ;;  %v367_v35 = vsub.s32 5, %v6124_v26  ;;  %v363_v25 = vsub.s32 4, %v6124_v26  ;;  %v4925_v0 = vld [vmem:[%s6656_s8 + $0x50] ss:$12 sps:$4 sm:$0xff]  }
 0x187   :  { %v2295_v5 = vmax.f32 %v2123_v2, 0.0  ;;  %v2078_v43 = vadd.f32 %v2077_v3, %v2027_v32  ;;  %v2127_v9 = vadd.f32 %v2126_v60, %v2076_v54  ;;  %v2330_v14 = vmul.f32 %v2312_v22, %v2294_v36  ;;  %v4913_v32 = vld [vmem:[%s6656_s8 + $0x98] ss:$12 sps:$4 sm:$0xff]  }
 0x188   :  { %v2128_v39 = vpop.f32.mrf.mxu1  ;;  %v2079_v12 = vpop.f32.mrf.mxu0  ;;  %v368_v36 = vrot.slane %v6147_v63, %v367_v35  ;;  %v364_v22 = vrot.slane %v6147_v63, %v363_v25  ;;  %v4929_v2 = vld [vmem:[%s6656_s8 + $0x38] ss:$12 sps:$4 sm:$0xff]  }
 0x189   :  { %v2331_v40 = vmul.f32 %v2313_v33, %v2295_v5  ;;  %v2129_v41 = vadd.f32 %v2128_v39, %v2078_v43  ;;  %v2300_v44 = vmax.f32 %v2127_v9, 0.0  ;;  %v2342_v31 = vpack.c.bf16 %v2330_v14, %v2324_v42  ;;  %v4920_v25 = vld [vmem:[%s6656_s8 + $0x64] ss:$12 sps:$4 sm:$0xff]  }
 0x18a   :  { %v2080_v23 = vpop.f32.mrf.mxu0  ;;  %v2130_v47 = vpop.f32.mrf.mxu1 }
 0x18b   :  { %v2301_v48 = vmax.f32 %v2129_v41, 0.0  ;;  %v2343_v49 = vpack.c.bf16 %v2331_v40, %v2325_v13  ;;  %v2336_v53 = vmul.f32 %v2318_v34, %v2300_v44 }
 0x18c   :  { %v2131_v52 = vpop.f32.mrf.mxu1 }
 0x18d   :  { %v2337_v19 = vmul.f32 %v2319_v45, %v2301_v48  ;;  %2946 = vmatprep.mubr.bf16.mxu0 %v2343_v49  ;;  %v2348_v56 = vpack.c.bf16 %v2336_v53, %v2336_v53  ;;  %v2314_v45 = vld [vmem:[%s6671_s26 + $0x50] sm:$0xff]  ;;  %v2309_v48 = vld [vmem:[%s6671_s26 + $0x28] sm:$0xff]  ;;  %v2315_v49 = vld [vmem:[%s6671_s26 + $0x58] sm:$0xff] }
 0x18e   :  { %2947 = vmatmul.mubr.bf16.vlgmr.msra.gmra.mxu0 %v2342_v31 }
 0x18f   :  { %v2349_v55 = vpack.c.bf16 %v2337_v19, %v2337_v19  ;;  %3282 = vmatpush1.bf16.msra.mxu0 %v4909_v30  ;;  %v2308_v19 = vld [vmem:[%s6671_s26 + $0x20] sm:$0xff]  ;;  %v4910_v30 = vld [vmem:[%s6656_s8 + $0x90] ss:$12 sps:$4 sm:$0xff]  }
 0x190   :  { %3283 = vmatprep.subr.bf16.mxu0 %v4991_v59 }
 0x191   :  { %2956 = vmatprep.mubr.bf16.mxu0 %v2349_v55 }
 0x193   :  { %3284 = vmatpush1.bf16.msra.mxu0 %v4913_v32 }
 0x194   :  { %3285 = vmatprep.subr.bf16.mxu0 %v4991_v59 }
 0x196   :  { %2957 = vmatmul.mubr.bf16.gmra.mxu0 %v2348_v56 }
 0x197   :  { %3286 = vmatpush1.bf16.msra.mxu0 %v4917_v15  ;;  %v4916_v15 = vld [vmem:[%s6656_s8 + $0x7c] ss:$12 sps:$4 sm:$0xff]  }
 0x198   :  { %3287 = vmatprep.subr.bf16.mxu0 %v4991_v59 }
 0x19b   :  { %3288 = vmatpush1.bf16.msra.mxu0 %v4921_v62  ;;  %v4914_v62 = vld [vmem:[%s6656_s8 + $0x78] ss:$12 sps:$4 sm:$0xff]  }
 0x19c   :  { %3289 = vmatprep.subr.bf16.mxu0 %v4991_v59 }
 0x19f   :  { %3290 = vmatpush1.bf16.msra.mxu0 %v4925_v0 }
 0x1a0   :  { %3291 = vmatprep.subr.bf16.mxu0 %v4991_v59 }
 0x1a3   :  { %3292 = vmatpush1.bf16.msra.mxu0 %v4929_v2  ;;  %v4924_v2 = vld [vmem:[%s6656_s8 + $0x4c] ss:$12 sps:$4 sm:$0xff]  }
 0x1a4   :  { %3293 = vmatprep.subr.bf16.mxu0 %v4991_v59 }
 0x1bc   :  { %v2167_v58 = vpop.f32.mrf.mxu0 }
 0x1bd   :  { %v2168_v38 = vadd.f32 %v2167_v58, %v364_v22 }
 0x1be   :  { %v2169_v61 = vpop.f32.mrf.mxu0  ;;  %v2218_v1 = vpop.f32.mrf.mxu1 }
 0x1bf   :  { %v2170_v54 = vadd.f32 %v2169_v61, %v368_v36  ;;  %v2219_v6 = vadd.f32 %v2218_v1, %v2168_v38  ;;  %v4922_v38 = vld [vmem:[%s6656_s8 + $0x48] ss:$12 sps:$4 sm:$0xff]  }
 0x1c0   :  { %v2171_v4 = vpop.f32.mrf.mxu0  ;;  %v2220_v50 = vpop.f32.mrf.mxu1 }
 0x1c1   :  { %v2172_v51 = vadd.f32 %v2171_v4, %v364_v22  ;;  %v2221_v3 = vadd.f32 %v2220_v50, %v2170_v54 }
 0x1c2   :  { %v2173_v7 = vpop.f32.mrf.mxu0  ;;  %v2222_v8 = vpop.f32.mrf.mxu1 }
 0x1c3   :  { %v2174_v60 = vadd.f32 %v2173_v7, %v368_v36  ;;  %v2223_v43 = vadd.f32 %v2222_v8, %v2172_v51  ;;  %v2321_v7 = vld [vmem:[%s6671_s26 + $0x88] sm:$0x3] }
 0x1c4   :  { %v2224_v10 = vpop.f32.mrf.mxu1  ;;  %v2177_v11 = vpop.f32.mrf.mxu0 }
 0x1c5   :  { %v2178_v9 = vadd.f32 %v2177_v11, %v364_v22  ;;  %v2225_v12 = vadd.f32 %v2224_v10, %v2174_v60  ;;  %v4926_v60 = vld [vmem:[%s6656_s8 + $0x30] ss:$12 sps:$4 sm:$0xff]  }
 0x1c6   :  { %v2179_v57 = vpop.f32.mrf.mxu0  ;;  %v2228_v17 = vpop.f32.mrf.mxu1 }
 0x1c7   :  { %v2180_v13 = vadd.f32 %v2179_v57, %v368_v36  ;;  %v2229_v47 = vadd.f32 %v2228_v17, %v2178_v9  ;;  %v4906_v57 = vld [vmem:[%s6656_s8 + $0xa8] ss:$12 sps:$4 sm:$0xff]   ;;  %v4918_v36 = vld [vmem:[%s6656_s8 + $0x60] ss:$12 sps:$4 sm:$0xff]   ;;  %v4930_v9 = vld [vmem:[%s6656_s8 + $0x18] ss:$12 sps:$4 sm:$0xff]  }
 0x1c8   :  { %v2181_v18 = vpop.f32.mrf.mxu0  ;;  %v2230_v16 = vpop.f32.mrf.mxu1 }
 0x1c9   :  { %v2231_v52 = vadd.f32 %v2230_v16, %v2180_v13 }
 0x1ca   :  { %v2182_v21 = vpop.f32.mrf.mxu0  ;;  %v2232_v24 = vpop.f32.mrf.mxu1 }
 0x1cb   :  { %v4912_v21 = vld [vmem:[%s6656_s8 + $0x94] ss:$12 sps:$4 sm:$0xff]  }
 0x1cc   :  { %v2233_v28 = vpop.f32.mrf.mxu1  ;;  %v2320_v24 = vld [vmem:[%s6671_s26 + $0x80] sm:$0x3] }
 0x1f4   :  { %v2269_v33 = vpop.f32.mrf.mxu0 }
 0x1f5   :  { %v2270_v14 = vadd.f32 %v2269_v33, %v2219_v6  ;;  %v4928_v33 = vld [vmem:[%s6656_s8 + $0x34] ss:$12 sps:$4 sm:$0xff]  }
 0x1f6   :  { %v2271_v5 = vpop.f32.mrf.mxu0 }
 0x1f7   :  { %v2272_v63 = vadd.f32 %v2271_v5, %v2221_v3  ;;  %v2290_v34 = vmax.f32 %v2270_v14, 0.0  ;;  %v4933_v14 = vld [vmem:[%s6656_s8 + $0x20] ss:$12 sps:$4 sm:$0xff]  }
 0x1f8   :  { %v2273_v39 = vpop.f32.mrf.mxu0  ;;  %3294 = vmatpush1.bf16.msra.mxu0 %v4933_v14  ;;  %v3422_v14 = vld [vmem:[%s6651_s3] sm:$0x1] }
 0x1f9   :  { %v2274_v40 = vadd.f32 %v2273_v39, %v2223_v43  ;;  %v2291_v42 = vmax.f32 %v2272_v63, 0.0  ;;  %v2326_v50 = vmul.f32 %v2308_v19, %v2290_v34  ;;  %v4932_v63 = vld [vmem:[%s6656_s8 + $0x1c] ss:$12 sps:$4 sm:$0xff]   ;;  %v2433_v39 = vld [vmem:[%s6655_s7] sm:$0x3]  ;;  %3295 = vmatprep.subr.bf16.mxu0 %v4991_v59 }
 0x1fa   :  { %v2275_v41 = vpop.f32.mrf.mxu0  ;;  %v2438_v13 = vrot.slane %v2433_v39, %v6150_v27 }
 0x1fb   :  { %v2296_v44 = vmax.f32 %v2274_v40, 0.0  ;;  %v2276_v23 = vadd.f32 %v2275_v41, %v2225_v12  ;;  %v2327_v61 = vmul.f32 %v2309_v48, %v2291_v42  ;;  %v4936_v12 = vld [vmem:[%s6656_s8 + $0x4] ss:$12 sps:$4 sm:$0xff]   ;;  %v4934_v40 = vld [vmem:[%s6656_s8] ss:$12 sps:$4 sm:$0xff]   ;;  %v2442_v42 = vrot.slane %v2433_v39, %v6139_v20  ;;  %v4943_v39 = vld [vmem:[%s6661_s13 + $0x38] sm:$0xff]  }
 0x1fc   :  { %v2279_v31 = vpop.f32.mrf.mxu0  ;;  %v4937_v41 = vld [vmem:[%s6656_s8 + $0x8] ss:$12 sps:$4 sm:$0xff]  }
 0x1fd   :  { %v2297_v53 = vmax.f32 %v2276_v23, 0.0  ;;  %v2332_v55 = vmul.f32 %v2314_v45, %v2296_v44  ;;  %v2280_v56 = vadd.f32 %v2279_v31, %v2229_v47  ;;  %3296 = vmatpush1.bf16.msra.mxu0 %v4937_v41  ;;  %v4940_v44 = vld [vmem:[%s6656_s8 + $0xc4] ss:$12 sps:$4 sm:$0xff]   ;;  %v4938_v23 = vld [vmem:[%s6656_s8 + $0xc0] ss:$12 sps:$4 sm:$0xff]  }
 0x1fe   :  { %v2281_v58 = vpop.f32.mrf.mxu0  ;;  %3311 = vmatprep.subr.bf16.mxu0 %v4991_v59  ;;  %v4941_v47 = vld [vmem:[%s6656_s8 + $0xc8] ss:$12 sps:$4 sm:$0xff]   ;;  %s3845_s8 = sshll.u32 %s4994_s24, 4  ;;  %s3846_s8 = int_to_ptr.vmem [resolvable:$true] %s3845_s8 }
 0x1ff   :  { %v2333_v1 = vmul.f32 %v2315_v49, %v2297_v53  ;;  %v2282_v4 = vadd.f32 %v2281_v58, %v2231_v52  ;;  %v2344_v17 = vpack.c.bf16 %v2332_v55, %v2326_v50  ;;  %v2302_v18 = vmax.f32 %v2280_v56, 0.0  ;;  %v4947_v41 = vld [vmem:[%s6661_s13 + $0x28] sm:$0xff]   ;;  %p4973_p1 = scmp.lt.s32.totalorder %s3846_s8, %s3846_s8 }
 0x200   :  { %v2283_v8 = vpop.f32.mrf.mxu0 }
 0x201   :  { %v2345_v10 = vpack.c.bf16 %v2333_v1, %v2327_v61  ;;  %v2303_v11 = vmax.f32 %v2282_v4, 0.0  ;;  %v2338_v32 = vmul.f32 %v2320_v24, %v2302_v18  ;;  %3312 = vmatpush2.bf16.msra.mxu0 %v4941_v47  ;;  %v4953_v47 = vld [vmem:[%s6661_s13 + $0x50] sm:$0xff]  }
 0x202   :  { %v2284_v16 = vpop.f32.mrf.mxu0 }
 0x203   :  { %v2339_v28 = vmul.f32 %v2321_v7, %v2303_v11  ;;  %4230 = vmatprep.mubr.msk.bf16.mxu1 %vm2850_vm3, %v2345_v10  ;;  %v2350_v35 = vpack.c.bf16 %v2338_v32, %v2338_v32  ;;  %v4992_v11 = vmov 0.0  }
 0x204   :  { %2998 = vmatmul.mubr.bf16.vlgmr.msra.gmra.mxu1 %v2344_v17  ;;  %4328 = vmatprep.subr.bf16.mxu0 %v4992_v11 }
 0x205   :  { %v2351_v29 = vpack.c.bf16 %v2339_v28, %v2339_v28  ;;  %3231 = vmatpush1.bf16.msra.mxu1 %v4906_v57 }
 0x206   :  { %3232 = vmatprep.subr.bf16.mxu1 %v4912_v21 }
 0x207   :  { %4231 = vmatprep.mubr.msk.bf16.mxu1 %vm2850_vm3, %v2351_v29  ;;  %v3437_v29 = vsel %vm3435_vm4, 4294967295, %v4990_v37 }
 0x209   :  { %3233 = vmatpush1.bf16.msra.mxu1 %v4910_v30 }
 0x20a   :  { %3234 = vmatprep.subr.bf16.mxu1 %v4916_v15 }
 0x20c   :  { %v2897_v0 = vpop.f32.mrf.mxu1  ;;  %3008 = vmatmul.mubr.bf16.gmra.mxu1 %v2350_v35 }
 0x20d   :  { %3235 = vmatpush1.bf16.msra.mxu1 %v4914_v62  ;;  %v2898_v45 = vadd.f32 %v2897_v0, %v2438_v13  ;;  %v3438_v0 = vsel %vm3436_vm5, %v3437_v29, 0 }
 0x20e   :  { %v2899_v22 = vpop.f32.mrf.mxu1  ;;  %3236 = vmatprep.subr.bf16.mxu1 %v4920_v25  ;;  %v3423_v25 = vld [vmem:[%s6658_s10] sm:$0x3] }
 0x20f   :  { %v2900_v48 = vadd.f32 %v2899_v22, %v2442_v42 }
 0x210   :  { %v2901_v54 = vpop.f32.mrf.mxu1 }
 0x211   :  { %3237 = vmatpush1.bf16.msra.mxu1 %v4918_v36  ;;  %v2902_v52 = vadd.f32 %v2901_v54, %v2438_v13 }
 0x212   :  { %v2903_v51 = vpop.f32.mrf.mxu1  ;;  %3238 = vmatprep.subr.bf16.mxu1 %v4924_v2 }
 0x213   :  { %v2904_v59 = vadd.f32 %v2903_v51, %v2442_v42 }
 0x214   :  { %v2907_v3 = vpop.f32.mrf.mxu1 }
 0x215   :  { %3239 = vmatpush1.bf16.msra.mxu1 %v4922_v38  ;;  %v2908_v58 = vadd.f32 %v2907_v3, %v2438_v13  ;;  %v4945_v13 = vld [vmem:[%s6661_s13 + $0x30] sm:$0xff]  }
 0x216   :  { %v2909_v6 = vpop.f32.mrf.mxu1  ;;  %3240 = vmatprep.subr.bf16.mxu1 %v4928_v33  ;;  %v3440_v33 = vand.u32 %v3438_v0, %v3423_v25 }
 0x217   :  { %v2910_v4 = vadd.f32 %v2909_v6, %v2442_v42  ;;  %v4948_v42 = vld [vmem:[%s6661_s13 + $0x60] sm:$0xff]  }
 0x218   :  { %v2911_v5 = vpop.f32.mrf.mxu1 }
 0x219   :  { %3241 = vmatpush1.bf16.msra.mxu1 %v4926_v60  ;;  %v4942_v60 = vld [vmem:[%s6661_s13 + $0x78] sm:$0xff]  }
 0x21a   :  { %v2912_v43 = vpop.f32.mrf.mxu1  ;;  %3242 = vmatprep.subr.bf16.mxu1 %v4932_v63 }
 0x21d   :  { %3243 = vmatpush1.bf16.msra.mxu1 %v4930_v9 }
 0x21e   :  { %3244 = vmatprep.subr.bf16.mxu1 %v4936_v12  ;;  %v4944_v12 = vld [vmem:[%s6661_s13 + $0x70] sm:$0xff]  }
 0x221   :  { %3245 = vmatpush1.bf16.msra.mxu1 %v4934_v40  ;;  %v4946_v40 = vld [vmem:[%s6661_s13 + $0x68] sm:$0xff]  }
 0x222   :  { %3260 = vmatprep.subr.bf16.mxu1 %v4940_v44  ;;  %v4949_v44 = vld [vmem:[%s6661_s13 + $0x20] sm:$0xff]  }
 0x225   :  { %3261 = vmatpush2.bf16.msra.mxu1 %v4938_v23  ;;  %v4952_v23 = vld [vmem:[%s6661_s13 + $0x18] sm:$0xff]  }
 0x226   :  { %4322 = vmatprep.subr.bf16.mxu1 %v4992_v11 }
 0x24e   :  { %v2948_v34 = vpop.f32.mrf.mxu0 }
 0x24f   :  { %v2949_v49 = vadd.f32 %v2948_v34, %v2898_v45  ;;  %v4951_v45 = vld [vmem:[%s6661_s13 + $0x58] sm:$0xff]   ;;  %v4954_v34 = vld [vmem:[%s6661_s13 + $0x10] sm:$0xff]  }
 0x250   :  { %v2950_v31 = vpop.f32.mrf.mxu0 }
 0x251   :  { %v2951_v19 = vadd.f32 %v2950_v31, %v2900_v48  ;;  %v4950_v48 = vld [vmem:[%s6661_s13 + $0x88] sm:$0xff]  }
 0x252   :  { %v2952_v53 = vpop.f32.mrf.mxu0  ;;  %v4957_v31 = vld [vmem:[%s6661_s13 + $0x8] sm:$0xff]  }
 0x253   :  { %v2953_v55 = vadd.f32 %v2952_v53, %v2902_v52  ;;  %v4955_v52 = vld [vmem:[%s6661_s13 + $0x80] sm:$0xff]  }
 0x254   :  { %v2954_v56 = vpop.f32.mrf.mxu0  ;;  %v4959_v53 = vld [vmem:[%s6661_s13] sm:$0xff]  }
 0x255   :  { %v2955_v61 = vadd.f32 %v2954_v56, %v2904_v59  ;;  %v3062_v59 = vld [vmem:[%s6657_s9] sm:$0x7] }
 0x256   :  { %v2958_v1 = vpop.f32.mrf.mxu0  ;;  %v3075_v56 = vrot.slane %v3062_v59, %v355_v46 }
 0x257   :  { %v2959_v50 = vadd.f32 %v2958_v1, %v2908_v58  ;;  %v6585_v58 = vrot.slane %v3062_v59, %v6139_v20 }
 0x258   :  { %v2960_v7 = vpop.f32.mrf.mxu0 }
 0x259   :  { %v2961_v8 = vadd.f32 %v2960_v7, %v2910_v4  ;;  %v3338_v7 = vld [vmem:[%s6650_s2] sm:$0xff] }
 0x25a   :  { %v2962_v10 = vpop.f32.mrf.mxu0 }
 0x25c   :  { %v2963_v57 = vpop.f32.mrf.mxu0 }
 0x2c4   :  { %v2999_v17 = vpop.f32.mrf.mxu1 }
 0x2c5   :  { %v3000_v16 = vadd.f32 %v2999_v17, %v2949_v49  ;;  %v4956_v49 = vld [vmem:[%s6661_s13 + $0x48] sm:$0xff]  }
 0x2c6   :  { %v3001_v18 = vpop.f32.mrf.mxu1 }
 0x2c7   :  { %v3002_v24 = vadd.f32 %v3001_v18, %v2951_v19  ;;  %v3016_v32 = vmax.f32 %v3000_v16, 0.0  ;;  %v4958_v19 = vld [vmem:[%s6661_s13 + $0x40] sm:$0xff]  }
 0x2c8   :  { %v3003_v21 = vpop.f32.mrf.mxu1 }
 0x2c9   :  { %v3004_v28 = vadd.f32 %v3003_v21, %v2953_v55  ;;  %v3017_v36 = vmax.f32 %v3002_v24, 0.0  ;;  %v3067_v55 = vrot.slane %v3062_v59, %v6150_v27  ;;  %v3339_v24 = vld [vmem:[%s6650_s2 + $0x8] sm:$0xff] }
 0x2ca   :  { %v3005_v30 = vpop.f32.mrf.mxu1 }
 0x2cb   :  { %v3018_v15 = vmax.f32 %v3004_v28, 0.0  ;;  %v3006_v62 = vadd.f32 %v3005_v30, %v2955_v61 }
 0x2cc   :  { %v3009_v35 = vpop.f32.mrf.mxu1 }
 0x2cd   :  { %v3022_v22 = vpack.c.bf16 %v3018_v15, %v3016_v32  ;;  %v3019_v2 = vmax.f32 %v3006_v62, 0.0  ;;  %v3010_v3 = vadd.f32 %v3009_v35, %v2959_v50  ;;  %v3341_v35 = vld [vmem:[%s6650_s2 + $0x18] sm:$0xff] }
 0x2ce   :  { %v3011_v54 = vpop.f32.mrf.mxu1 }
 0x2cf   :  { %v3023_v38 = vpack.c.bf16 %v3019_v2, %v3017_v36  ;;  %v3012_v51 = vadd.f32 %v3011_v54, %v2961_v8  ;;  %v3020_v63 = vmax.f32 %v3010_v3, 0.0  ;;  %v3340_v8 = vld [vmem:[%s6650_s2 + $0x10] sm:$0xff]  ;;  %v3343_v2 = vld [vmem:[%s6650_s2 + $0x28] sm:$0xff] }
 0x2d0   :  { %v3013_v37 = vpop.f32.mrf.mxu1 }
 0x2d1   :  { %v3021_v6 = vmax.f32 %v3012_v51, 0.0  ;;  %4259 = vmatprep.mubr.msk.bf16.mxu1 %vm3223_vm6, %v3023_v38  ;;  %4261 = vmatprep.mubr.msk.bf16.mxu0 %vm3223_vm6, %v3023_v38  ;;  %v3024_v9 = vpack.c.bf16 %v3020_v63, %v3020_v63 }
 0x2d2   :  { %v3014_v5 = vpop.f32.mrf.mxu1  ;;  %3263 = vmatmul.mubr.bf16.vlgmr.msra.gmra.mxu1 %v3022_v22  ;;  %3314 = vmatmul.mubr.bf16.vlgmr.msra.gmra.mxu0 %v3022_v22 }
 0x2d3   :  { %v3025_v43 = vpack.c.bf16 %v3021_v6, %v3021_v6  ;;  %4323 = vmatpush3.bf16.msra.mxu1 %v3440_v33  ;;  %4329 = vmatpush3.bf16.msra.mxu0 %v4950_v48 }
 0x2d4   :  { %4292 = vmatprep.subr.bf16.mxu1 %v4942_v60  ;;  %4330 = vmatprep.subr.bf16.mxu0 %v4992_v11 }
 0x2d5   :  { %4260 = vmatprep.mubr.msk.bf16.mxu1 %vm3223_vm6, %v3025_v43  ;;  %4262 = vmatprep.mubr.msk.bf16.mxu0 %vm3223_vm6, %v3025_v43 }
 0x2d7   :  { %4331 = vmatpush3.bf16.msra.mxu0 %v4955_v52 }
 0x2d8   :  { %4336 = vmatprep.subr.bf16.mxu0 %v4992_v11 }
 0x2da   :  { %3273 = vmatmul.mubr.bf16.gmra.mxu1 %v3024_v9  ;;  %3322 = vmatmul.mubr.bf16.gmra.mxu0 %v3024_v9 }
 0x2db   :  { %4324 = vmatprep.mubr.msk.bf16.mxu1 %vm4993_vm7, %v4992_v11  ;;  %4332 = vmatprep.mubr.msk.bf16.mxu0 %vm4993_vm7, %v4992_v11 }
 0x2e2   :  { %4325 = vmatmul.mubr.msk.bf16.vlgmr.msra.gmra.mxu1 %vm3431_vm8, %v3422_v14 }
 0x2e3   :  { %4293 = vmatpush3.bf16.msra.mxu1 %v4943_v39 }
 0x2e4   :  { %4294 = vmatprep.subr.bf16.mxu1 %v4944_v12 }
 0x2e7   :  { %4295 = vmatpush3.bf16.msra.mxu1 %v4945_v13 }
 0x2e8   :  { %4296 = vmatprep.subr.bf16.mxu1 %v4946_v40  ;;  %v3342_v40 = vld [vmem:[%s6650_s2 + $0x20] sm:$0xff] }
 0x2eb   :  { %4297 = vmatpush3.bf16.msra.mxu1 %v4947_v41 }
 0x2ec   :  { %4298 = vmatprep.subr.bf16.mxu1 %v4948_v42 }
 0x2ef   :  { %4299 = vmatpush3.bf16.msra.mxu1 %v4949_v44 }
 0x2f0   :  { %4300 = vmatprep.subr.bf16.mxu1 %v4951_v45 }
 0x2f3   :  { %4301 = vmatpush3.bf16.msra.mxu1 %v4952_v23 }
 0x2f4   :  { %4302 = vmatprep.subr.bf16.mxu1 %v4953_v47 }
 0x2f7   :  { %4303 = vmatpush3.bf16.msra.mxu1 %v4954_v34 }
 0x2f8   :  { %4304 = vmatprep.subr.bf16.mxu1 %v4956_v49 }
 0x2fb   :  { %4305 = vmatpush3.bf16.msra.mxu1 %v4957_v31 }
 0x2fc   :  { %4306 = vmatprep.subr.bf16.mxu1 %v4958_v19 }
 0x2ff   :  { %4307 = vmatpush3.bf16.msra.mxu1 %v4959_v53 }
 0x392   :  { %v3264_v61 = vpop.f32.mrf.mxu1  ;;  %v3315_v1 = vpop.f32.mrf.mxu0 }
 0x393   :  { %v3265_v4 = vadd.f32 %v3264_v61, %v3067_v55  ;;  %v3316_v50 = vadd.f32 %v3315_v1, %v3075_v56 }
 0x394   :  { %v3266_v10 = vpop.f32.mrf.mxu1  ;;  %v3317_v27 = vpop.f32.mrf.mxu0 }
 0x395   :  { %v3329_v57 = vmax.f32 %v3265_v4, 0.0  ;;  %v3331_v26 = vmax.f32 %v3316_v50, 0.0  ;;  %v3267_v46 = vadd.f32 %v3266_v10, %v6585_v58 }
 0x396   :  { %v3268_v20 = vpop.f32.mrf.mxu1  ;;  %v3318_v17 = vpop.f32.mrf.mxu0 }
 0x397   :  { %v3347_v18 = vmul.f32 %v3338_v7, %v3329_v57  ;;  %v3349_v16 = vmul.f32 %v3340_v8, %v3331_v26  ;;  %v3330_v21 = vmax.f32 %v3267_v46, 0.0  ;;  %v3269_v28 = vadd.f32 %v3268_v20, %v3067_v55 }
 0x398   :  { %v3319_v29 = vadd.f32 %v3318_v17, %v3075_v56  ;;  %v3270_v30 = vpop.f32.mrf.mxu1  ;;  %v3320_v32 = vpop.f32.mrf.mxu0 }
 0x399   :  { %v3359_v15 = vrot.slane %v3347_v18, 2  ;;  %v3361_v62 = vrot.slane %v3349_v16, 2  ;;  %v3368_v25 = vrot.slane %v3347_v18, 4  ;;  %v3370_v0 = vrot.slane %v3349_v16, 4 }
 0x39a   :  { %v3348_v36 = vmul.f32 %v3339_v24, %v3330_v21  ;;  %v3332_v22 = vmax.f32 %v3269_v28, 0.0  ;;  %v3274_v54 = vpop.f32.mrf.mxu1  ;;  %v3323_v38 = vpop.f32.mrf.mxu0  ;;  %v3334_v3 = vmax.f32 %v3319_v29, 0.0  ;;  %v3271_v37 = vadd.f32 %v3270_v30, %v6585_v58  ;;  %v3344_v29 = vld [vmem:[%s6650_s2 + $0x30] sm:$0x3] }
 0x39b   :  { %v3365_v51 = vadd.f32 %v3359_v15, %v3347_v18  ;;  %v3367_v33 = vadd.f32 %v3361_v62, %v3349_v16  ;;  %v3377_v60 = vrot.slane %v3347_v18, 6  ;;  %v3379_v6 = vrot.slane %v3349_v16, 6 }
 0x39c   :  { %v3360_v5 = vrot.slane %v3348_v36, 2  ;;  %v3350_v43 = vmul.f32 %v3341_v35, %v3332_v22  ;;  %v3276_v63 = vpop.f32.mrf.mxu1  ;;  %v3325_v9 = vpop.f32.mrf.mxu0  ;;  %v3352_v12 = vmul.f32 %v3343_v2, %v3334_v3  ;;  %v3333_v13 = vmax.f32 %v3271_v37, 0.0  ;;  %v4263_v3 = vld [vmem:[%s6659_s11] ss:$0 sm:$0xff] }
 0x39d   :  { %v3374_v14 = vadd.f32 %v3368_v25, %v3365_v51  ;;  %v3376_v39 = vadd.f32 %v3370_v0, %v3367_v33  ;;  %v3369_v42 = vrot.slane %v3348_v36, 4  ;;  %v3378_v23 = vrot.slane %v3348_v36, 6  ;;  %v3345_v0 = vld [vmem:[%s6650_s2 + $0x38] sm:$0x3] }
 0x39e   :  { %v3366_v41 = vadd.f32 %v3360_v5, %v3348_v36  ;;  %v3278_v44 = vpop.f32.mrf.mxu1  ;;  %v3326_v45 = vpop.f32.mrf.mxu0  ;;  %v3351_v49 = vmul.f32 %v3342_v40, %v3333_v13  ;;  %v3275_v31 = vadd.f32 %v3274_v54, %v3067_v55  ;;  %v3324_v52 = vadd.f32 %v3323_v38, %v3075_v56  ;;  %v3346_v55 = vld [vmem:[%s6650_s2 + $0x40] sm:$0x3] }
 0x39f   :  { %v3383_v47 = vadd.f32 %v3377_v60, %v3374_v14  ;;  %v3385_v34 = vadd.f32 %v3379_v6, %v3376_v39  ;;  %v3392_v61 = vrot.slane %v3350_v43, 2  ;;  %v3394_v4 = vrot.slane %v3352_v12, 2  ;;  %v3483_v36 = vld [vmem:[%s6660_s12] sm:$0xf] }
 0x3a0   :  { %v3375_v48 = vadd.f32 %v3369_v42, %v3366_v41  ;;  %v3279_v19 = vpop.f32.mrf.mxu1  ;;  %v3327_v53 = vpop.f32.mrf.mxu0  ;;  %v3401_v7 = vrot.slane %v3350_v43, 4  ;;  %v3403_v8 = vrot.slane %v3352_v12, 4  ;;  %v3337_v57 = vmax.f32 %v3324_v52, 0.0  ;;  %v4961_v13 = vld [vmem:[%s6663_s15] sm:$0xff]  }
 0x3a1   :  { %v3386_v59 = vadd.f32 %v3383_v47, %v3350_v43  ;;  %v3388_v1 = vadd.f32 %v3385_v34, %v3352_v12  ;;  %v3277_v46 = vadd.f32 %v3276_v63, %v6585_v58  ;;  %v3393_v17 = vrot.slane %v3351_v49, 2 }
 0x3a2   :  { %v3384_v50 = vadd.f32 %v3378_v23, %v3375_v48  ;;  %v3476_v10 = vpop.f32.mrf.mxu1  ;;  %v3335_v18 = vmax.f32 %v3275_v31, 0.0  ;;  %v3410_v21 = vrot.slane %v3350_v43, 6  ;;  %v3412_v28 = vrot.slane %v3352_v12, 6  ;;  %v4960_v12 = vld [vmem:[%s6663_s15 + $0x8] sm:$0xff]   ;;  %v4285_v31 = vld [vmem:[%s6662_s14] ss:$0 sm:$0xff] }
 0x3a3   :  { %v3398_v27 = vadd.f32 %v3392_v61, %v3386_v59  ;;  %v3400_v26 = vadd.f32 %v3394_v4, %v3388_v1  ;;  %v3336_v30 = vmax.f32 %v3277_v46, 0.0  ;;  %v3402_v58 = vrot.slane %v3351_v49, 4  ;;  %s4968_s14 = scalar_lea.vmem %s3846_s8, 32 }
 0x3a4   :  { %v3387_v20 = vadd.f32 %v3384_v50, %v3351_v49  ;;  %v4326_v56 = vpop.f32.mrf.mxu1  ;;  %v3355_v35 = vmul.f32 %v3346_v55, %v3337_v57  ;;  %v3411_v2 = vrot.slane %v3351_v49, 6  ;;  %v3353_v38 = vmul.f32 %v3344_v29, %v3335_v18  ;;  %v4286_v50 = vld [vmem:[%s6664_s16] ss:$0 sm:$0xff]  ;;  %p4969_p0 = scmp.ne.s32.totalorder %s3846_s8, %s4968_s14  ;;  %p4974_p2 = scmp.lt.s32.totalorder %s4968_s14, %s4968_s14 }
 0x3a5   :  { %v3407_v16 = vadd.f32 %v3401_v7, %v3398_v27  ;;  %v3409_v24 = vadd.f32 %v3403_v8, %v3400_v26  ;;  %v3354_v33 = vmul.f32 %v3345_v0, %v3336_v30  ;;  %v3719_v5 = vsel %vm1805_vm0, %v3483_v36, 0 }
 0x3a6   :  { %v3479_v32 = vpop.f32.mrf.mxu1  ;;  %v3399_v15 = vadd.f32 %v3393_v17, %v3387_v20  ;;  %v3477_v63 = vadd.f32 %v4263_v3, %v3476_v10  ;;  %p4975_p3 = por %p4974_p2, %p4973_p1 }
 0x3a7   :  { %v3416_v62 = vadd.f32 %v3410_v21, %v3407_v16  ;;  %v3418_v25 = vadd.f32 %v3412_v28, %v3409_v24 }
 0x3a8   :  { %v3408_v22 = vadd.f32 %v3402_v58, %v3399_v15  ;;  %v4327_v54 = vpop.f32.mrf.mxu1  ;;  %v3482_v39 = vpack.c.bf16 %v3477_v63, %v3477_v63  ;;  %p4976_p4 = pnand %p4975_p3, %p4969_p0 }
 0x3a9   :  { %v3421_v51 = vadd.f32 %v3418_v25, %v3355_v35  ;;  %v3419_v60 = vadd.f32 %v3416_v62, %v3353_v38 }
 0x3aa   :  { %v3417_v37 = vadd.f32 %v3411_v2, %v3408_v22 }
 0x3ab   :  { %v3486_v6 = vpack.c.bf16 %v3421_v51, %v3421_v51  ;;  %v3484_v14 = vpack.c.bf16 %v3419_v60, %v3419_v60 }
 0x3ac   :  { %v3420_v43 = vadd.f32 %v3417_v37, %v3354_v33 }
 0x3ad   :  { %4333 = vmatmul.mubr.msk.bf16.vlgmr.msra.gmra.mxu0 %vm3631_vm9, %v3486_v6 }
 0x3ae   :  { %4337 = vmatpush3.bf16.msra.mxu0 %v3719_v5  ;;  %v3485_v9 = vpack.c.bf16 %v3420_v43, %v3420_v43  ;;  %4338 = vmatprep.mubr.msk.bf16.mxu0 %vm4993_vm7, %v4992_v11 }
 0x3af   :  { %4342 = vmatprep.subr.bf16.mxu0 %v4992_v11 }
 0x3b0   :  { %3667 = vmatprep.mubr.bf16.mxu1 %v3485_v9 }
 0x3b1   :  { %3668 = vmatmul.mubr.bf16.vlgmr.msra.gmra.mxu1 %v3484_v14 }
 0x3b5   :  { %4339 = vmatmul.mubr.msk.bf16.vlgmr.msra.gmra.mxu0 %vm2850_vm3, %v3482_v39 }
 0x3b6   :  { %4346 = vmatprep.mubr.msk.bf16.mxu0 %vm4993_vm7, %v4992_v11  ;;  %4343 = vmatpush3.bf16.msra.mxu0 %v4960_v12 }
 0x3b7   :  { %4344 = vmatprep.subr.bf16.mxu0 %v4992_v11 }
 0x3ba   :  { %4345 = vmatpush3.bf16.msra.mxu0 %v4961_v13 }
 0x46d   :  { %v3709_v40 = vpop.f32.mrf.mxu0 }
 0x46f   :  { %v4334_v41 = vpop.f32.mrf.mxu0 }
 0x471   :  { %v4308_v42 = vpop.f32.mrf.mxu1  ;;  %v3712_v44 = vpop.f32.mrf.mxu0 }
 0x473   :  { %v4309_v45 = vpop.f32.mrf.mxu1  ;;  %v4335_v23 = vpop.f32.mrf.mxu0 }
 0x474   :  { %v4310_v47 = vadd.f32 %v4309_v45, %v4308_v42 }
 0x475   :  { %v4311_v34 = vpop.f32.mrf.mxu1  ;;  %v3755_v48 = vpop.f32.mrf.mxu0 }
 0x476   :  { %v3710_v49 = vadd.f32 %v4310_v47, %v3709_v40 }
 0x477   :  { %v4312_v52 = vpop.f32.mrf.mxu1  ;;  %v4340_v19 = vpop.f32.mrf.mxu0 }
 0x478   :  { %v3756_v53 = vadd.f32 %v3755_v48, %v3710_v49 }
 0x479   :  { %v3758_v59 = vpop.f32.mrf.mxu0 }
 0x47a   :  { %v3768_v11 = vadd.f32 %v4285_v31, %v3756_v53 }
 0x47b   :  { %v4341_v61 = vpop.f32.mrf.mxu0 }
 0x47c   :  { %v3769_v1 = vmax.f32 %v3768_v11, 0.0 }
 0x47e   :  { %v3770_v4 = vpack.c.bf16 %v3769_v1, %v3769_v1 }
 0x480   :  { %4347 = vmatmul.mubr.msk.bf16.vlgmr.msra.gmra.mxu0 %vm3631_vm9, %v3770_v4 }
 0x540   :  { %v3831_v7 = vpop.f32.mrf.mxu0 }
 0x541   :  { %v3832_v8 = vadd.f32 %v4286_v50, %v3831_v7 }
 0x542   :  { %v4348_v10 = vpop.f32.mrf.mxu0 }
 0x543   :  { %3838 = vst.msk [vmem:[#allocation2] sm:$0x3] %vm3837_vm10, %v3832_v8 }
 0x544   :  { %v3834_v27 = vpop.f32.mrf.mxu0 }
 0x545   :  { %4979 = shalt.err (!%p4976_p4)
}
 0x546   :  { %3848 = dma.vmem_to_hbm [thread:$0]  %s3846_s8, 32, %s6665_s17, [#allocation3]   ;;  %v4349_v57 = vpop.f32.mrf.mxu0 }
 0x547   :  { %4988 = dma.done.wait [#allocation3], 32  }
 0x548   :  { %4989 = vsyncadd [#allocation3], 4294967264 }
 0x549   :  { %3852 = vsyncpa [#allocation3], 1 }

</bundles_post_ra>
